<compile_context>
chip_gen: v5e
topology: v5e:2x2
jax: 0.10.0
libtpu: 0.0.40
codegen_flags: <defaults>
</compile_context>

<pallas_src>
import functools

import jax
import jax.numpy as jnp
from jax.experimental import pallas as pl
from jax.experimental.pallas import tpu as pltpu


# ------------------------- fused Pallas kernel -------------------------

def _cross_attention_kernel(x1_ref, x2_ref, wq_ref, bq_ref, wkv_ref, bkv_ref,
                            o_ref, *, dim):
    """One (batch, query-tile) grid point.
    x1_ref: (1, TQ, C) bf16   x2_ref: (1, N, C) bf16
    wq_ref: (C, C) bf16 (scale pre-folded)   bq_ref: (1, C) f32 (scale pre-folded)
    wkv_ref: (C, 2C) bf16 (k|v fused)        bkv_ref: (1, 2C) f32
    o_ref: (1, TQ, C) f32
    """
    x1 = x1_ref[0]                                   # (TQ, C) bf16
    x2 = x2_ref[0]                                   # (N,  C) bf16

    # q projection; softmax scale already folded into wq/bq by the wrapper.
    q = (jnp.dot(x1, wq_ref[...], preferred_element_type=jnp.float32)
         + bq_ref[...]).astype(jnp.bfloat16)         # (TQ, C)

    # Fused k|v projection: one matmul over x2, then tile-aligned slices.
    kv = (jnp.dot(x2, wkv_ref[...], preferred_element_type=jnp.float32)
          + bkv_ref[...])                            # (N, 2C) f32
    k = kv[:, :dim].astype(jnp.bfloat16)             # (N, C)
    v = kv[:, dim:].astype(jnp.bfloat16)             # (N, C)

    # logits[i, j] = sum_c q[i, c] * k[j, c]  — transposed-rhs MXU matmul
    # (identical dimension_numbers to the official Pallas flash-attention).
    logits = jax.lax.dot_general(
        q, k, dimension_numbers=(((1,), (1,)), ((), ())),
        preferred_element_type=jnp.float32)          # (TQ, N)

    # Numerically stable softmax over keys (lane axis).
    m = jnp.max(logits, axis=-1, keepdims=True)
    p = jnp.exp(logits - m)
    denom = jnp.sum(p, axis=-1, keepdims=True)
    p = (p * pl.reciprocal(denom, approx=True)).astype(jnp.bfloat16)

    # out[i, c] = sum_j p[i, j] * v[j, c]  — plain (TQ,N)@(N,C) matmul.
    o_ref[0] = jnp.dot(p, v, preferred_element_type=jnp.float32).astype(o_ref.dtype)


# ------------------------- wrapper -------------------------

def _pick_query_tile(n):
    for cand in (512, 256, 128, 64, 32, 16, 8):
        if cand <= n and n % cand == 0:
            return cand
    return n


def cross_attention_pallas(params, x1, x2):
    """x1, x2: (B, C, H, W) float32 -> (B, C, H, W) float32."""
    B, C, H, W = x1.shape
    N = H * W
    scale = float(C) ** -0.5
    TQ = _pick_query_tile(N)

    # NCHW -> (B, N, C) channels-last + bf16 cast.  XLA fuses the transpose
    # and the convert into a single pass over x (layout plumbing only).
    def to_nc(t):
        return jnp.transpose(t.reshape(B, C, N), (0, 2, 1)).astype(jnp.bfloat16)

    x1_nc = to_nc(x1)
    x2_nc = to_nc(x2)

    # torch Conv2d 1x1 weight is (C_out, C_in); pass W^T so the kernel does
    # X @ W^T.  Softmax scale folded into the q path (done once, for free).
    wq = (params["wq"] * scale).T.astype(jnp.bfloat16)
    bq = (params["bq"] * scale).reshape(1, C).astype(jnp.float32)
    # Fused k|v projection: (C, 2C) weight, (1, 2C) bias.
    wkv = jnp.concatenate([params["wk"].T, params["wv"].T], axis=1).astype(jnp.bfloat16)
    bkv = jnp.concatenate([params["bk"], params["bv"]]).reshape(1, 2 * C).astype(jnp.float32)

    # Per-generation VMEM limit: ~3/4 of physical, capped at 100 MiB
    # (=> ~48 MiB on v7x, ~96 MiB on v5e/v6e).
    try:
        vmem_cap = getattr(pltpu.get_tpu_info(), "vmem_capacity_bytes",
                           64 * 1024 * 1024)
    except Exception:
        vmem_cap = 64 * 1024 * 1024
    vmem_limit = int(min(vmem_cap * 3 // 4, 100 * 1024 * 1024))

    q_block = lambda b, qi: (b, qi, 0)       # query / output tiles
    kv_block = lambda b, qi: (b, 0, 0)       # full key/value side per batch
    shared = lambda b, qi: (0, 0)            # weights / biases (resident)

    out_nc = pl.pallas_call(
        functools.partial(_cross_attention_kernel, dim=C),
        out_shape=jax.ShapeDtypeStruct((B, N, C), jnp.float32),
        grid=(B, N // TQ),
        in_specs=[
            pl.BlockSpec((1, TQ, C), q_block),    # x1 (query tile)
            pl.BlockSpec((1, N, C), kv_block),    # x2 (full keys/values)
            pl.BlockSpec((C, C), shared),         # wq^T * scale
            pl.BlockSpec((1, C), shared),         # bq * scale
            pl.BlockSpec((C, 2 * C), shared),     # [wk^T | wv^T]
            pl.BlockSpec((1, 2 * C), shared),     # [bk | bv]
        ],
        out_specs=pl.BlockSpec((1, TQ, C), q_block),
        compiler_params=pltpu.CompilerParams(
            dimension_semantics=("parallel", "parallel"),
            vmem_limit_bytes=vmem_limit),
    )(x1_nc, x2_nc, wq, bq, wkv, bkv)

    # (B, N, C) -> (B, C, H, W)
    return jnp.transpose(out_nc, (0, 2, 1)).reshape(B, C, H, W)


# ------------------------- parameters & pure-JAX reference -------------------------

def init_cross_attention_params(dim, key):
    ks = jax.random.split(key, 6)
    s = dim ** -0.5
    return {
        "wq": s * jax.random.normal(ks[0], (dim, dim), jnp.float32),
        "bq": s * jax.random.normal(ks[1], (dim,), jnp.float32),
        "wk": s * jax.random.normal(ks[2], (dim, dim), jnp.float32),
        "bk": s * jax.random.normal(ks[3], (dim,), jnp.float32),
        "wv": s * jax.random.normal(ks[4], (dim, dim), jnp.float32),
        "bv": s * jax.random.normal(ks[5], (dim,), jnp.float32),
    }


def cross_attention_ref(params, x1, x2):
    """Pure-JAX f32 reference mirroring the PyTorch forward exactly."""
    B, C, H, W = x1.shape
    N = H * W
    scale = float(C) ** -0.5

    def pw(x, w, b):  # 1x1 conv on NCHW, flattened spatially
        return jnp.einsum("oi,bin->bon", w, x.reshape(B, C, N)) + b[None, :, None]

    q = pw(x1, params["wq"], params["bq"])
    k = pw(x2, params["wk"], params["bk"])
    v = pw(x2, params["wv"], params["bv"])
    attn = jnp.einsum("bci,bcj->bij", q, k) * scale
    attn = jax.nn.softmax(attn, axis=-1)
    out = jnp.einsum("bcj,bij->bci", v, attn)
    return out.reshape(B, C, H, W)


# ------------------------- test -------------------------

if __name__ == "__main__":
    B, dim, H, W = 2, 128, 16, 16        # dim lane-dense, N = 256 queries/keys
    key = jax.random.PRNGKey(0)
    k1, k2, kp = jax.random.split(key, 3)
    x1 = jax.random.normal(k1, (B, dim, H, W), jnp.float32)
    x2 = jax.random.normal(k2, (B, dim, H, W), jnp.float32)
    params = init_cross_attention_params(dim, kp)

    out = jax.jit(cross_attention_pallas)(params, x1, x2)
    jax.block_until_ready(out)

    ref = cross_attention_ref(params, x1, x2)
    assert out.shape == (B, dim, H, W)
    assert bool(jnp.all(jnp.isfinite(out)))
    # bf16 MXU operands + approx reciprocal intentionally deviate from the
    # f32 reference by up to ~1e-2; tolerance covers it.
    err = float(jnp.max(jnp.abs(out - ref)))
    assert err < 8e-2, f"max abs err vs f32 reference: {err}"
    print("KERNEL_OK")
</pallas_src>

<mosaic_0001>
module attributes {stable_mosaic.version = 11 : i64} {
  func.func @_cross_attention_kernel(%arg0: i32, %arg1: i32, %arg2: memref<1x256x128xbf16, #tpu.memory_space<vmem>>, %arg3: memref<1x256x128xbf16, #tpu.memory_space<vmem>>, %arg4: memref<128x128xbf16, #tpu.memory_space<vmem>>, %arg5: memref<1x128xf32, #tpu.memory_space<vmem>>, %arg6: memref<128x256xbf16, #tpu.memory_space<vmem>>, %arg7: memref<1x256xf32, #tpu.memory_space<vmem>>, %arg8: memref<1x256x128xf32, #tpu.memory_space<vmem>>) attributes {dimension_semantics = [#tpu.dimension_semantics<parallel>, #tpu.dimension_semantics<parallel>], iteration_bounds = array<i64: 2, 1>, scalar_prefetch = 0 : i64, scratch_operands = 0 : i64, tpu.core_type = #tpu.core_type<tc>, window_params = [{transform_indices = @transform_0, window_bounds = array<i64: 1, 256, 128>}, {transform_indices = @transform_1, window_bounds = array<i64: 1, 256, 128>}, {pipeline_mode = #tpu.pipeline_mode<synchronous>, transform_indices = @transform_2, window_bounds = array<i64: 128, 128>}, {pipeline_mode = #tpu.pipeline_mode<synchronous>, transform_indices = @transform_3, window_bounds = array<i64: 1, 128>}, {pipeline_mode = #tpu.pipeline_mode<synchronous>, transform_indices = @transform_4, window_bounds = array<i64: 128, 256>}, {pipeline_mode = #tpu.pipeline_mode<synchronous>, transform_indices = @transform_5, window_bounds = array<i64: 1, 256>}, {transform_indices = @transform_6, window_bounds = array<i64: 1, 256, 128>}]} {
    %c0 = arith.constant 0 : index
    %c0_0 = arith.constant 0 : index
    %c0_1 = arith.constant 0 : index
    %0 = vector.load %arg2[%c0, %c0_0, %c0_1] : memref<1x256x128xbf16, #tpu.memory_space<vmem>>, vector<1x256x128xbf16>
    %1 = vector.shape_cast %0 : vector<1x256x128xbf16> to vector<256x128xbf16>
    %c0_2 = arith.constant 0 : index
    %c0_3 = arith.constant 0 : index
    %c0_4 = arith.constant 0 : index
    %2 = vector.load %arg3[%c0_2, %c0_3, %c0_4] : memref<1x256x128xbf16, #tpu.memory_space<vmem>>, vector<1x256x128xbf16>
    %3 = vector.shape_cast %2 : vector<1x256x128xbf16> to vector<256x128xbf16>
    %c0_5 = arith.constant 0 : index
    %c0_6 = arith.constant 0 : index
    %4 = vector.load %arg4[%c0_5, %c0_6] : memref<128x128xbf16, #tpu.memory_space<vmem>>, vector<128x128xbf16>
    %cst = arith.constant dense<0.000000e+00> : vector<256x128xf32>
    %5 = tpu.matmul %1, %4, %cst {dimension_numbers = #tpu.dot_dimension_numbers<[1], [0], [0], [1], [0, 0, 1, 1], [], []>} : vector<256x128xbf16>, vector<128x128xbf16>, vector<256x128xf32> -> vector<256x128xf32>
    %c0_7 = arith.constant 0 : index
    %c0_8 = arith.constant 0 : index
    %6 = vector.load %arg5[%c0_7, %c0_8] : memref<1x128xf32, #tpu.memory_space<vmem>>, vector<1x128xf32>
    %7 = vector.broadcast %6 : vector<1x128xf32> to vector<256x128xf32>
    %8 = arith.addf %5, %7 : vector<256x128xf32>
    %9 = arith.truncf %8 : vector<256x128xf32> to vector<256x128xbf16>
    %c0_9 = arith.constant 0 : index
    %c0_10 = arith.constant 0 : index
    %10 = vector.load %arg6[%c0_9, %c0_10] : memref<128x256xbf16, #tpu.memory_space<vmem>>, vector<128x256xbf16>
    %cst_11 = arith.constant dense<0.000000e+00> : vector<256x256xf32>
    %11 = tpu.matmul %3, %10, %cst_11 {dimension_numbers = #tpu.dot_dimension_numbers<[1], [0], [0], [1], [0, 0, 1, 1], [], []>} : vector<256x128xbf16>, vector<128x256xbf16>, vector<256x256xf32> -> vector<256x256xf32>
    %c0_12 = arith.constant 0 : index
    %c0_13 = arith.constant 0 : index
    %12 = vector.load %arg7[%c0_12, %c0_13] : memref<1x256xf32, #tpu.memory_space<vmem>>, vector<1x256xf32>
    %13 = vector.broadcast %12 : vector<1x256xf32> to vector<256x256xf32>
    %14 = arith.addf %11, %13 : vector<256x256xf32>
    %15 = vector.extract_strided_slice %14 {offsets = [0, 0], sizes = [256, 128], strides = [1, 1]} : vector<256x256xf32> to vector<256x128xf32>
    %16 = arith.truncf %15 : vector<256x128xf32> to vector<256x128xbf16>
    %17 = vector.extract_strided_slice %14 {offsets = [0, 128], sizes = [256, 128], strides = [1, 1]} : vector<256x256xf32> to vector<256x128xf32>
    %18 = arith.truncf %17 : vector<256x128xf32> to vector<256x128xbf16>
    %cst_14 = arith.constant dense<0.000000e+00> : vector<256x256xf32>
    %19 = tpu.matmul %9, %16, %cst_14 {dimension_numbers = #tpu.dot_dimension_numbers<[1], [1], [0], [0], [0, 0, 1, 0], [], []>} : vector<256x128xbf16>, vector<256x128xbf16>, vector<256x256xf32> -> vector<256x256xf32>
    %cst_15 = arith.constant dense<0xFF800000> : vector<256xf32>
    %20 = vector.multi_reduction <maximumf>, %19, %cst_15 [1] : vector<256x256xf32> to vector<256xf32>
    %21 = vector.shape_cast %20 : vector<256xf32> to vector<256x1xf32>
    %22 = vector.broadcast %21 : vector<256x1xf32> to vector<256x256xf32>
    %23 = arith.subf %19, %22 : vector<256x256xf32>
    %24 = math.exp %23 : vector<256x256xf32>
    %cst_16 = arith.constant dense<0.000000e+00> : vector<256xf32>
    %25 = vector.multi_reduction <add>, %24, %cst_16 [1] : vector<256x256xf32> to vector<256xf32>
    %26 = vector.shape_cast %25 : vector<256xf32> to vector<256x1xf32>
    %27 = tpu.reciprocal %26 {approx = true} : vector<256x1xf32> -> vector<256x1xf32>
    %28 = vector.broadcast %27 : vector<256x1xf32> to vector<256x256xf32>
    %29 = arith.mulf %24, %28 : vector<256x256xf32>
    %30 = arith.truncf %29 : vector<256x256xf32> to vector<256x256xbf16>
    %cst_17 = arith.constant dense<0.000000e+00> : vector<256x128xf32>
    %31 = tpu.matmul %30, %18, %cst_17 {dimension_numbers = #tpu.dot_dimension_numbers<[1], [0], [0], [1], [0, 0, 1, 1], [], []>} : vector<256x256xbf16>, vector<256x128xbf16>, vector<256x128xf32> -> vector<256x128xf32>
    %c0_18 = arith.constant 0 : index
    %c0_19 = arith.constant 0 : index
    %c0_20 = arith.constant 0 : index
    %32 = vector.load %arg8[%c0_18, %c0_19, %c0_20] : memref<1x256x128xf32, #tpu.memory_space<vmem>>, vector<1x256x128xf32>
    %33 = vector.shape_cast %32 : vector<1x256x128xf32> to vector<256x128xf32>
    %34 = vector.shape_cast %31 : vector<256x128xf32> to vector<1x256x128xf32>
    tpu.vector_store %arg8[%c0_18, %c0_19, %c0_20], %34 {strides = array<i32>} : memref<1x256x128xf32, #tpu.memory_space<vmem>>, vector<1x256x128xf32>,
    return
  }
  func.func @transform_0(%arg0: i32, %arg1: i32) -> (i32, i32, i32) {
    %c0_i32 = arith.constant 0 : i32
    %c0_i32_0 = arith.constant 0 : i32
    return %arg0, %arg1, %c0_i32 : i32, i32, i32
  }
  func.func @transform_1(%arg0: i32, %arg1: i32) -> (i32, i32, i32) {
    %c0_i32 = arith.constant 0 : i32
    %c0_i32_0 = arith.constant 0 : i32
    %c0_i32_1 = arith.constant 0 : i32
    return %arg0, %c0_i32, %c0_i32_0 : i32, i32, i32
  }
  func.func @transform_2(%arg0: i32, %arg1: i32) -> (i32, i32) {
    %c0_i32 = arith.constant 0 : i32
    %c0_i32_0 = arith.constant 0 : i32
    %c0_i32_1 = arith.constant 0 : i32
    return %c0_i32, %c0_i32_0 : i32, i32
  }
  func.func @transform_3(%arg0: i32, %arg1: i32) -> (i32, i32) {
    %c0_i32 = arith.constant 0 : i32
    %c0_i32_0 = arith.constant 0 : i32
    %c0_i32_1 = arith.constant 0 : i32
    return %c0_i32, %c0_i32_0 : i32, i32
  }
  func.func @transform_4(%arg0: i32, %arg1: i32) -> (i32, i32) {
    %c0_i32 = arith.constant 0 : i32
    %c0_i32_0 = arith.constant 0 : i32
    %c0_i32_1 = arith.constant 0 : i32
    return %c0_i32, %c0_i32_0 : i32, i32
  }
  func.func @transform_5(%arg0: i32, %arg1: i32) -> (i32, i32) {
    %c0_i32 = arith.constant 0 : i32
    %c0_i32_0 = arith.constant 0 : i32
    %c0_i32_1 = arith.constant 0 : i32
    return %c0_i32, %c0_i32_0 : i32, i32
  }
  func.func @transform_6(%arg0: i32, %arg1: i32) -> (i32, i32, i32) {
    %c0_i32 = arith.constant 0 : i32
    %c0_i32_0 = arith.constant 0 : i32
    return %arg0, %arg1, %c0_i32 : i32, i32, i32
  }
}

</mosaic_0001>

<bundles_post_ra>
// kernel: cross_attention_pallas.1
= control target key start
LH: loop header
LB: loop body
LE: loop exit
PB: predicated region body
PF: predicated region fallthrough
CT: control target
= control target key end

     0   :  { %11 = vsyncpa [#allocation3], 0  ;;  %s3912_s0 = inlined_call_operand.vmem [shape: bf16[2,256,128], index: 0, kind: input, shape index: {}]   ;;  %s3913_s1 = inlined_call_operand.vmem [shape: bf16[2,256,128], index: 1, kind: input, shape index: {}]   ;;  %s3914_s2 = inlined_call_operand.vmem [shape: bf16[128,128], index: 2, kind: input, shape index: {}]   ;;  %s3915_s3 = inlined_call_operand.vmem [shape: f32[1,128], index: 3, kind: input, shape index: {}]   ;;  %s3916_s4 = inlined_call_operand.vmem [shape: bf16[128,256], index: 4, kind: input, shape index: {}]   ;;  %s3917_s5 = inlined_call_operand.vmem [shape: f32[1,256], index: 5, kind: input, shape index: {}]   ;;  %s3918_s6 = inlined_call_operand.hbm [shape: f32[2,256,128], index: 6, kind: output, shape index: {}]  }
   0x1   :  { %13 = vsyncpa [#allocation3 + $0x1], 0  ;;  %s2740_s21 = smov 0   ;;  %s2742_s22 = smov 0  }
   0x2   :  { %s2744_s23 = smov 0   ;;  %s2746_s24 = smov 0  }
   0x3   :  { %s2748_s25 = smov 0   ;;  %s2750_s26 = smov 0  }
   0x4 LB: > { %s2051_s27 = sadd.s32 4294967295, %s2701_s26   ;;  %s2052_s28 = sadd.s32 4294967294, %s2701_s26   ;;  %s2701_s26 = sphi %s2750_s26, %s19_s26   ;;  %s2697_s25 = sphi %s2748_s25, %s3925_s25   ;;  %s2693_s24 = sphi %s2746_s24, %s3924_s24   ;;  %s2689_s23 = sphi %s2744_s23, %s3923_s23   ;;  %s2685_s22 = sphi %s2742_s22, %s3922_s22   ;;  %s2681_s21 = sphi %s2740_s21, %s3921_s21  }
   0x5   : > { %s31_s29 = sadd.s32 1, %s2697_s25  ;;  %s178_s30 = sadd.s32 1, %s2689_s23 }
   0x6   : > { %p33_p0 = scmp.ge.s32.totalorder %s31_s29, 2  ;;  %p188_p1 = scmp.ne.s32.totalorder %s2689_s23, %s2685_s22 }
   0x7   : > { %p189_p2 = scmp.eq.s32.totalorder %s2051_s27, 1  ;;  %p194_p3 = scmp.ne.s32.totalorder %s2685_s22, %s2681_s21 }
   0x8   : > { %s3927_s29 = smov (%p33_p0, %s31_s29), 0  ;;  %p195_p5 = scmp.eq.s32.totalorder %s2052_s28, 1 }
   0x9   : > { %p2780_p4 = por %p189_p2, %p188_p1  ;;  %s173_s8 = ssub.s32 %s2697_s25, %s3927_s29 }
   0xa   : > { %p2055_p6 = scmp.ge.s32.totalorder %s2701_s26, 1  ;;  %p176_p7 = scmp.eq.s32.totalorder %s173_s8, 0 }
   0xb   : > { %p2787_p8 = por %p195_p5, %p194_p3  ;;  %p246_p9 = scmp.lt.s32.totalorder %s2701_s26, 3 }
   0xc   : > { %s2793_s10 = scalar_select %p176_p7, %s2689_s23, %s178_s30  }
   0xd   : > { %p247_p10 = pnand %p2055_p6, %p246_p9 }
   0xe   : > { %p286_p11 = scmp.lt.s32.totalorder (!%p247_p10), %s2693_s24, 1  ;;  %s2348_s11 = sshll.u32 (!%p247_p10), %s2693_s24, 8 }
   0xf   : > { %250 = sbr.rel (%p247_p10) target bundleno = 1409 (0x581), region = 44  ;;  %s1956_s14 = scalar_lea.hbm (!%p247_p10), %s3918_s6, %s2348_s11 }
  0x10   : > { %s1959_s16 = sshll.u32 (!%p247_p10), %s1956_s14, 4  ;;  %s2643_s27 = scalar_lea.hbm (!%p247_p10), %s3918_s6, 512  ;;  %s1960_s16 = int_to_ptr.hbm [resolvable:$true] %s1959_s16 }
  0x11   : > { %s2637_s18 = sshra.s32 (!%p247_p10), %s1960_s16, 4  ;;  %s2638_s18 = int_to_ptr.hbm [resolvable:$true] %s2637_s18 }
  0x12   : > { %p2644_p1 = scmp.lt.s32.totalorder (!%p247_p10), %s2638_s18, %s3918_s6 }
  0x14   : > { %v2331_v0 = vld [vmem:[%s3914_s2 + $0x38] sm:$0xff]  ;;  %v2279_v1 = vld [vmem:[%s3916_s4 + $0x70] sm:$0xf]  ;;  %v2271_v4 = vld [vmem:[%s3916_s4 + $0x60] sm:$0xf]  ;;  %s287_s19 = scalar_select %p286_p11, %s2693_s24, 1 }
  0x15   : > { %v2347_v2 = vld [vmem:[%s3916_s4 + $0x74] sm:$0xf0]  ;;  %v2345_v5 = vld [vmem:[%s3916_s4 + $0x64] sm:$0xf0]  ;;  %529 = vmatpush.bf16.msra.mxu0 %v2331_v0  ;;  %v2330_v6 = vld [vmem:[%s3914_s2 + $0x30] sm:$0xff]  ;;  %2349 = vmatpush.bf16.msra.mxu3 %v2331_v0  ;;  %s2639_s24 = scalar_lea.hbm %s2638_s18, 256 }
  0x16   : > { %v2280_v3 = vor.u32 %v2347_v2, %v2279_v1  ;;  %v2272_v7 = vor.u32 %v2345_v5, %v2271_v4  ;;  %v2263_v8 = vld [vmem:[%s3916_s4 + $0x50] sm:$0xf]  ;;  %v2343_v9 = vld [vmem:[%s3916_s4 + $0x54] sm:$0xf0]  ;;  %v2329_v10 = vld [vmem:[%s3914_s2 + $0x28] sm:$0xff]  ;;  %s2290_s12 = sshll.u32 %s287_s19, 7  ;;  %p2640_p12 = scmp.ne.s32.totalorder %s2638_s18, %s2639_s24 }
  0x17   : > { %v2264_v11 = vor.u32 %v2343_v9, %v2263_v8  ;;  %v2255_v12 = vld [vmem:[%s3916_s4 + $0x40] sm:$0xf]  ;;  %v2341_v13 = vld [vmem:[%s3916_s4 + $0x44] sm:$0xf0]  ;;  %v2247_v16 = vld [vmem:[%s3916_s4 + $0x30] sm:$0xf]  ;;  %s2872_s28 = scalar_lea.vmem %s3912_s0, %s2290_s12  ;;  %s2877_s8 = scalar_lea.vmem %s3913_s1, %s2290_s12 }
  0x18   : > { %2357 = vmatpush.bf16.msra.mxu1 %v2280_v3  ;;  %v2328_v14 = vld [vmem:[%s3914_s2 + $0x20] sm:$0xff]  ;;  %v2256_v15 = vor.u32 %v2341_v13, %v2255_v12  ;;  %v2339_v17 = vld [vmem:[%s3916_s4 + $0x34] sm:$0xf0]  ;;  %v2337_v21 = vld [vmem:[%s3916_s4 + $0x24] sm:$0xf0]  ;;  %p2641_p13 = pnand %p2640_p12, %p2780_p4  ;;  %p2645_p2 = scmp.lt.s32.totalorder %s2643_s27, %s2639_s24 }
  0x19   : > { %530 = vmatpush.bf16.msra.mxu0 %v2330_v6  ;;  %2350 = vmatpush.bf16.msra.mxu3 %v2330_v6  ;;  %v2327_v18 = vld [vmem:[%s3914_s2 + $0x18] sm:$0xff]  ;;  %v2248_v19 = vor.u32 %v2339_v17, %v2247_v16  ;;  %v2239_v20 = vld [vmem:[%s3916_s4 + $0x20] sm:$0xf]  ;;  %v2326_v22 = vld [vmem:[%s3914_s2 + $0x10] sm:$0xff] }
  0x1a   : > { %v2240_v23 = vor.u32 %v2337_v21, %v2239_v20  ;;  %v2231_v24 = vld [vmem:[%s3916_s4 + $0x10] sm:$0xf]  ;;  %v2335_v25 = vld [vmem:[%s3916_s4 + $0x14] sm:$0xf0]  ;;  %v2325_v26 = vld [vmem:[%s3914_s2 + $0x8] sm:$0xff]  ;;  %p2642_p0 = pneg %p2641_p13  ;;  %p2646_p3 = por %p2645_p2, %p2644_p1 }
  0x1b   : > { %v2232_v27 = vor.u32 %v2335_v25, %v2231_v24  ;;  %v2223_v28 = vld [vmem:[%s3916_s4] sm:$0xf]  ;;  %v2333_v29 = vld [vmem:[%s3916_s4 + $0x4] sm:$0xf0]  ;;  %v2294_v36 = vld [vmem:[%s2872_s28 + $0x10] sm:$0xff] }
  0x1c   : > { %2358 = vmatpush.bf16.msra.mxu1 %v2272_v7  ;;  %v2324_v30 = vld [vmem:[%s3914_s2] sm:$0xff]  ;;  %v2224_v31 = vor.u32 %v2333_v29, %v2223_v28  ;;  %v2293_v34 = vld [vmem:[%s2872_s28 + $0x8] sm:$0xff]  ;;  %v2891_v37 = vld [vmem:[%s2877_s8 + $0x30] sm:$0xff]  ;;  %p2647_p5 = pnand %p2646_p3, %p2642_p0 }
  0x1d   : > { %531 = vmatpush.bf16.msra.mxu0 %v2329_v10  ;;  %2351 = vmatpush.bf16.msra.mxu3 %v2329_v10  ;;  %v2292_v32 = vld [vmem:[%s2872_s28] sm:$0xff]  ;;  %v2886_v35 = vld [vmem:[%s2877_s8 + $0x28] sm:$0xff]  ;;  %v2295_v38 = vld [vmem:[%s2872_s28 + $0x18] sm:$0xff] }
  0x1e   : > { %v2881_v33 = vld [vmem:[%s2877_s8 + $0x20] sm:$0xff]  ;;  %v2896_v39 = vld [vmem:[%s2877_s8 + $0x38] sm:$0xff]  ;;  %v2297_v43 = vld [vmem:[%s2872_s28 + $0x28] sm:$0xff] }
  0x1f   : > { %v2296_v40 = vld [vmem:[%s2872_s28 + $0x20] sm:$0xff]  ;;  %v2910_v44 = vld [vmem:[%s2877_s8 + $0x8] sm:$0xff]  ;;  %v2298_v46 = vld [vmem:[%s2872_s28 + $0x30] sm:$0xff] }
  0x20   : > { %2359 = vmatpush.bf16.msra.mxu1 %v2264_v11  ;;  %v2901_v41 = vld [vmem:[%s2877_s8] sm:$0xff]  ;;  %v2913_v45 = vld [vmem:[%s2877_s8 + $0x48] sm:$0xff]  ;;  %v2919_v47 = vld [vmem:[%s2877_s8 + $0x10] sm:$0xff] }
  0x21   : > { %532 = vmatpush.bf16.msra.mxu0 %v2328_v14  ;;  %2352 = vmatpush.bf16.msra.mxu3 %v2328_v14  ;;  %v2904_v42 = vld [vmem:[%s2877_s8 + $0x40] sm:$0xff]  ;;  %v2922_v48 = vld [vmem:[%s2877_s8 + $0x50] sm:$0xff]  ;;  %v2299_v49 = vld [vmem:[%s2872_s28 + $0x38] sm:$0xff] }
  0x22   : > { %v2928_v50 = vld [vmem:[%s2877_s8 + $0x18] sm:$0xff]  ;;  %v2300_v52 = vld [vmem:[%s2872_s28 + $0x40] sm:$0xff]  ;;  %v2301_v58 = vld [vmem:[%s2872_s28 + $0x48] sm:$0xff] }
  0x23   : > { %v2931_v51 = vld [vmem:[%s2877_s8 + $0x58] sm:$0xff]  ;;  %v2939_v54 = vld [vmem:[%s2877_s8 + $0x60] sm:$0xff]  ;;  %v2952_v60 = vld [vmem:[%s2877_s8 + $0x68] sm:$0xff] }
  0x24   : > { %2360 = vmatpush.bf16.msra.mxu1 %v2256_v15  ;;  %v2302_v0 = vld [vmem:[%s2872_s28 + $0x50] sm:$0xff]  ;;  %v2281_v5 = vld [vmem:[%s3916_s4 + $0x78] sm:$0xf0]  ;;  %v2273_v8 = vld [vmem:[%s3916_s4 + $0x68] sm:$0xf0] }
  0x25   : > { %533 = vmatpush.bf16.msra.mxu0 %v2327_v18  ;;  %2353 = vmatpush.bf16.msra.mxu3 %v2327_v18  ;;  %v2965_v2 = vld [vmem:[%s2877_s8 + $0x70] sm:$0xff]  ;;  %v2265_v13 = vld [vmem:[%s3916_s4 + $0x58] sm:$0xf0]  ;;  %v2340_v16 = vld [vmem:[%s3916_s4 + $0x44] sm:$0xf] }
  0x26   : > { %v2346_v4 = vld [vmem:[%s3916_s4 + $0x74] sm:$0xf]  ;;  %v2303_v14 = vld [vmem:[%s2872_s28 + $0x58] sm:$0xff]  ;;  %v2257_v17 = vld [vmem:[%s3916_s4 + $0x48] sm:$0xf0] }
  0x27   : > { %v2284_v6 = vor.u32 %v2346_v4, %v2281_v5  ;;  %v2342_v12 = vld [vmem:[%s3916_s4 + $0x54] sm:$0xf]  ;;  %v2260_v18 = vor.u32 %v2340_v16, %v2257_v17  ;;  %v3000_v20 = vld [vmem:[%s2877_s8 + $0x78] sm:$0xff]  ;;  %v3012_v25 = vld [vmem:[%s3917_s5] sm:$0x3]  ;;  %s282_s8 = sand.u32 1, %s2685_s22  }
  0x28   : > { %2361 = vmatpush.bf16.msra.mxu1 %v2248_v19  ;;  %v3021_v29 = vperm.slane %v3012_v25, 0  ;;  %s2056_s19 = sshll.u32 %s282_s8, 8  ;;  %s1943_s17 = scalar_lea.sflag [#allocation3], %s282_s8 }
  0x29   : > { %534 = vmatpush.bf16.msra.mxu0 %v2326_v22  ;;  %2354 = vmatpush.bf16.msra.mxu3 %v2326_v22  ;;  %v2338_v22 = vld [vmem:[%s3916_s4 + $0x34] sm:$0xf]  ;;  %s3673_s30 = scalar_lea.vmem [#allocation2], %s2056_s19 }
  0x2a   : > { %2365 = vmatpush.bf16.msra.mxu2 %v2284_v6  ;;  %s1957_s15 = sshll.u32 %s3673_s30, 4  ;;  %s1958_s15 = int_to_ptr.vmem [resolvable:$true] %s1957_s15 }
  0x2c   : > { %2362 = vmatpush.bf16.msra.mxu1 %v2240_v23 }
  0x2d   : > { %535 = vmatpush.bf16.msra.mxu0 %v2325_v26  ;;  %2355 = vmatpush.bf16.msra.mxu3 %v2325_v26  ;;  %v2336_v26 = vld [vmem:[%s3916_s4 + $0x24] sm:$0xf] }
  0x30   : > { %2363 = vmatpush.bf16.msra.mxu1 %v2232_v27 }
  0x31   : > { %536 = vmatpush.bf16.msra.mxu0 %v2324_v30  ;;  %2356 = vmatpush.bf16.msra.mxu3 %v2324_v30 }
  0x34   : > { %2364 = vmatpush.bf16.msra.mxu1 %v2224_v31  ;;  %537 = vmatmul.bf16.vlgmr.msra.gmra.mxu0 %v2292_v32  ;;  %v2334_v32 = vld [vmem:[%s3916_s4 + $0x14] sm:$0xf] }
  0x35   : > { %832 = vmatpush.bf16.msrb.mxu0 %v2280_v3  ;;  %557 = vmatmul.bf16.vlgmr.msra.gmra.mxu3 %v2296_v40  ;;  %v2304_v40 = vld [vmem:[%s2872_s28 + $0x60] sm:$0xff] }
  0x37   : > { %860 = vmatmul.bf16.vlgmr.msra.gmra.mxu1 %v2881_v33 }
  0x39   : > { %833 = vmatpush.bf16.msrb.mxu0 %v2272_v7  ;;  %v2344_v7 = vld [vmem:[%s3916_s4 + $0x64] sm:$0xf] }
  0x3a   : > { %v2276_v9 = vor.u32 %v2344_v7, %v2273_v8 }
  0x3c   : > { %2366 = vmatpush.bf16.msra.mxu2 %v2276_v9 }
  0x3d   : > { %834 = vmatpush.bf16.msrb.mxu0 %v2264_v11 }
  0x41   : > { %835 = vmatpush.bf16.msrb.mxu0 %v2256_v15  ;;  %v2268_v15 = vor.u32 %v2342_v12, %v2265_v13  ;;  %v2305_v13 = vld [vmem:[%s2872_s28 + $0x68] sm:$0xff] }
  0x43   : > { %2367 = vmatpush.bf16.msra.mxu2 %v2268_v15 }
  0x44   : > { %542 = vmatmul.bf16.gmra.mxu0 %v2293_v34  ;;  %v2233_v34 = vld [vmem:[%s3916_s4 + $0x18] sm:$0xf0] }
  0x45   : > { %836 = vmatpush.bf16.msrb.mxu0 %v2248_v19  ;;  %562 = vmatmul.bf16.gmra.mxu3 %v2297_v43  ;;  %v2236_v43 = vor.u32 %v2334_v32, %v2233_v34 }
  0x47   : > { %865 = vmatmul.bf16.gmra.mxu1 %v2886_v35  ;;  %2368 = vmatpush.bf16.msra.mxu2 %v2260_v18 }
  0x49   : > { %837 = vmatpush.bf16.msrb.mxu0 %v2240_v23  ;;  %v2249_v23 = vld [vmem:[%s3916_s4 + $0x38] sm:$0xf0] }
  0x4a   : > { %v2252_v24 = vor.u32 %v2338_v22, %v2249_v23  ;;  %v2307_v23 = vld [vmem:[%s2872_s28 + $0x78] sm:$0xff] }
  0x4c   : > { %2369 = vmatpush.bf16.msra.mxu2 %v2252_v24 }
  0x4d   : > { %838 = vmatpush.bf16.msrb.mxu0 %v2232_v27  ;;  %v2241_v27 = vld [vmem:[%s3916_s4 + $0x28] sm:$0xf0] }
  0x4e   : > { %v2244_v28 = vor.u32 %v2336_v26, %v2241_v27 }
  0x50   : > { %2370 = vmatpush.bf16.msra.mxu2 %v2244_v28 }
  0x51   : > { %839 = vmatpush.bf16.msrb.mxu0 %v2224_v31 }
  0x54   : > { %547 = vmatmul.bf16.gmra.mxu0 %v2294_v36  ;;  %2371 = vmatpush.bf16.msra.mxu2 %v2236_v43 }
  0x55   : > { %567 = vmatmul.bf16.gmra.mxu3 %v2298_v46  ;;  %921 = vmatpush.bf16.msra.mxu0 %v2284_v6 }
  0x57   : > { %870 = vmatmul.bf16.gmra.mxu1 %v2891_v37 }
  0x59   : > { %922 = vmatpush.bf16.msra.mxu0 %v2276_v9 }
  0x5d   : > { %923 = vmatpush.bf16.msra.mxu0 %v2268_v15 }
  0x61   : > { %924 = vmatpush.bf16.msra.mxu0 %v2260_v18  ;;  %v2306_v18 = vld [vmem:[%s2872_s28 + $0x70] sm:$0xff] }
  0x64   : > { %552 = vmatmul.bf16.gmra.mxu0 %v2295_v38 }
  0x65   : > { %572 = vmatmul.bf16.gmra.mxu3 %v2299_v49  ;;  %925 = vmatpush.bf16.msra.mxu0 %v2252_v24  ;;  %v2332_v49 = vld [vmem:[%s3916_s4 + $0x4] sm:$0xf] }
  0x67   : > { %875 = vmatmul.bf16.gmra.mxu1 %v2896_v39 }
  0x69   : > { %926 = vmatpush.bf16.msra.mxu0 %v2244_v28 }
  0x6d   : > { %927 = vmatpush.bf16.msra.mxu0 %v2236_v43 }
  0x74   : > { %840 = vmatmul.bf16.vlgmr.msrb.gmra.mxu0 %v2901_v41 }
  0x75   : > { %577 = vmatmul.bf16.gmra.mxu3 %v2300_v52  ;;  %v2225_v52 = vld [vmem:[%s3916_s4 + $0x8] sm:$0xf0] }
  0x77   : > { %880 = vmatmul.bf16.gmra.mxu1 %v2904_v42 }
  0x84   : > { %845 = vmatmul.bf16.gmra.mxu0 %v2910_v44 }
  0x85   : > { %582 = vmatmul.bf16.gmra.mxu3 %v2301_v58  ;;  %v2228_v58 = vor.u32 %v2332_v49, %v2225_v52 }
  0x87   : > { %885 = vmatmul.bf16.gmra.mxu1 %v2913_v45  ;;  %2372 = vmatpush.bf16.msra.mxu2 %v2228_v58 }
  0x88   : > { %928 = vmatpush.bf16.msra.mxu0 %v2228_v58 }
  0x8a   : > { %949 = vmatmul.bf16.vlgmr.msra.gmra.mxu2 %v2881_v33 }
  0x94   : > { %850 = vmatmul.bf16.gmra.mxu0 %v2919_v47 }
  0x95   : > { %587 = vmatmul.bf16.gmra.mxu3 %v2302_v0 }
  0x97   : > { %890 = vmatmul.bf16.gmra.mxu1 %v2922_v48 }
  0x9a   : > { %954 = vmatmul.bf16.gmra.mxu2 %v2886_v35 }
  0xa4   : > { %855 = vmatmul.bf16.gmra.mxu0 %v2928_v50 }
  0xa5   : > { %592 = vmatmul.bf16.gmra.mxu3 %v2303_v14 }
  0xa7   : > { %895 = vmatmul.bf16.gmra.mxu1 %v2931_v51 }
  0xaa   : > { %959 = vmatmul.bf16.gmra.mxu2 %v2891_v37 }
  0xb1   : > { %v2936_v53 = vpop.f32.mrf.mxu0 }
  0xb4   : > { %v2941_v55 = vpop.f32.mrf.mxu1  ;;  %929 = vmatmul.bf16.vlgmr.msra.gmra.mxu0 %v2901_v41 }
  0xb5   : > { %597 = vmatmul.bf16.gmra.mxu3 %v2304_v40 }
  0xb7   : > { %900 = vmatmul.bf16.gmra.mxu1 %v2939_v54 }
  0xb9   : > { %v2944_v56 = vpop.f32.mrf.mxu0 }
  0xba   : > { %964 = vmatmul.bf16.gmra.mxu2 %v2896_v39 }
  0xbc   : > { %v2946_v57 = vpop.f32.mrf.mxu1 }
  0xbd   : > { %v864_v33 = vadd.f32 %v2946_v57, %v3021_v29 }
  0xc1   : > { %v2949_v59 = vpop.f32.mrf.mxu0 }
  0xc4   : > { %v2954_v61 = vpop.f32.mrf.mxu1  ;;  %934 = vmatmul.bf16.gmra.mxu0 %v2910_v44 }
  0xc5   : > { %v867_v12 = vadd.f32 %v2954_v61, %v3021_v29  ;;  %602 = vmatmul.bf16.gmra.mxu3 %v2305_v13  ;;  %v3064_v61 = vpop.f32.mrf.mxu3 }
  0xc7   : > { %905 = vmatmul.bf16.gmra.mxu1 %v2952_v60 }
  0xc9   : > { %v2957_v62 = vpop.f32.mrf.mxu0 }
  0xca   : > { %969 = vmatmul.bf16.gmra.mxu2 %v2904_v42  ;;  %v3109_v42 = vld [vmem:[%s3915_s3] ss:$0 sm:$0xff] }
  0xcc   : > { %v2959_v63 = vpop.f32.mrf.mxu1 }
  0xcd   : > { %v869_v8 = vadd.f32 %v2959_v63, %v3021_v29  ;;  %v862_v63 = vadd.f32 %v2941_v55, %v3021_v29  ;;  %v3069_v57 = vpop.f32.mrf.mxu3 }
  0xcf   : > { %v1015_v14 = vpack.c.bf16 %v869_v8, %v867_v12  ;;  %v1014_v15 = vpack.c.bf16 %v864_v33, %v862_v63  ;;  %v539_v12 = vadd.f32 %v3109_v42, %v2936_v53  ;;  %v546_v53 = vadd.f32 %v3109_v42, %v2957_v62 }
  0xd1   : > { %v2962_v1 = vpop.f32.mrf.mxu0 }
  0xd4   : > { %v2967_v3 = vpop.f32.mrf.mxu1  ;;  %939 = vmatmul.bf16.gmra.mxu0 %v2919_v47 }
  0xd5   : > { %v872_v6 = vadd.f32 %v2967_v3, %v3021_v29  ;;  %607 = vmatmul.bf16.gmra.mxu3 %v2306_v18  ;;  %v3077_v44 = vpop.f32.mrf.mxu3 }
  0xd7   : > { %910 = vmatmul.bf16.gmra.mxu1 %v2965_v2 }
  0xd9   : > { %v2982_v10 = vpop.f32.mrf.mxu0 }
  0xda   : > { %974 = vmatmul.bf16.gmra.mxu2 %v2913_v45  ;;  %v544_v45 = vadd.f32 %v3109_v42, %v2949_v59  ;;  %v551_v18 = vadd.f32 %v3109_v42, %v2982_v10 }
  0xdc   : > { %v873_v11 = vpop.f32.mrf.mxu1 }
  0xdd   : > { %v874_v0 = vadd.f32 %v873_v11, %v3021_v29  ;;  %v3082_v27 = vpop.f32.mrf.mxu3 }
  0xdf   : > { %v1016_v7 = vpack.c.bf16 %v874_v0, %v872_v6 }
  0xe1   : > { %v2997_v19 = vpop.f32.mrf.mxu0 }
  0xe4   : > { %v876_v21 = vpop.f32.mrf.mxu1  ;;  %944 = vmatmul.bf16.gmra.mxu0 %v2928_v50 }
  0xe5   : > { %v877_v36 = vadd.f32 %v876_v21, %v3021_v29  ;;  %612 = vmatmul.bf16.gmra.mxu3 %v2307_v23 }
  0xe7   : > { %915 = vmatmul.bf16.gmra.mxu1 %v3000_v20 }
  0xe9   : > { %v3023_v30 = vpop.f32.mrf.mxu0 }
  0xea   : > { %979 = vmatmul.bf16.gmra.mxu2 %v2922_v48  ;;  %v549_v48 = vadd.f32 %v3109_v42, %v2962_v1 }
  0xec   : > { %v878_v31 = vpop.f32.mrf.mxu1  ;;  %v3140_v62 = vpack.c.bf16 %v551_v18, %v549_v48 }
  0xed   : > { %v879_v38 = vadd.f32 %v878_v31, %v3021_v29 }
  0xef   : > { %v1017_v46 = vpack.c.bf16 %v879_v38, %v877_v36  ;;  %v3092_v38 = vpop.f32.mrf.mxu3 }
  0xf1   : > { %1042 = vmatpush.bf16.xpose.msrb.mxu3 %v1017_v46  ;;  %v3041_v4 = vpop.f32.mrf.mxu0 }
  0xf2   : > { %v842_v58 = vadd.f32 %v3041_v4, %v3021_v29  ;;  %v541_v4 = vadd.f32 %v3109_v42, %v2944_v56  ;;  %v3128_v56 = vpack.c.bf16 %v546_v53, %v544_v45  ;;  %v566_v53 = vadd.f32 %v3109_v42, %v3082_v27 }
  0xf4   : > { %v3043_v5 = vpop.f32.mrf.mxu1  ;;  %v3116_v13 = vpack.c.bf16 %v541_v4, %v539_v12 }
  0xf7   : > { %v3099_v46 = vpop.f32.mrf.mxu3 }
  0xf9   : > { %1043 = vmatpush.bf16.xpose.msrb.mxu3 %v1016_v7  ;;  %v843_v9 = vpop.f32.mrf.mxu0 }
  0xfa   : > { %v844_v0 = vadd.f32 %v843_v9, %v3021_v29  ;;  %984 = vmatmul.bf16.gmra.mxu2 %v2931_v51 }
  0xfc   : > { %v3051_v11 = vpop.f32.mrf.mxu1  ;;  %v1010_v8 = vpack.c.bf16 %v844_v0, %v842_v58  ;;  %v559_v58 = vadd.f32 %v3109_v42, %v3064_v61  ;;  %v561_v0 = vadd.f32 %v3109_v42, %v3069_v57 }
  0xfd   : > { %v884_v27 = vadd.f32 %v3051_v11, %v3021_v29 }
  0xfe   : > { %v3179_v4 = vpack.c.bf16 %v561_v0, %v559_v58 }
  0xff   : > { %v3104_v6 = vpop.f32.mrf.mxu3 }
 0x101   : > { %1044 = vmatpush.bf16.xpose.msrb.mxu3 %v1015_v14  ;;  %v846_v3 = vpop.f32.mrf.mxu0 }
 0x102   : > { %v847_v50 = vadd.f32 %v846_v3, %v3021_v29 }
 0x104   : > { %v3058_v41 = vpop.f32.mrf.mxu1 }
 0x105   : > { %v887_v48 = vadd.f32 %v3058_v41, %v3021_v29 }
 0x107   : > { %v3118_v14 = vpop.f32.mrf.mxu3 }
 0x109   : > { %1045 = vmatpush.bf16.xpose.msrb.mxu3 %v1014_v15  ;;  %v848_v16 = vpop.f32.mrf.mxu0 }
 0x10a   : > { %v849_v43 = vadd.f32 %v848_v16, %v3021_v29  ;;  %989 = vmatmul.bf16.gmra.mxu2 %v2939_v54 }
 0x10c   : > { %v3066_v17 = vpop.f32.mrf.mxu1  ;;  %v1011_v52 = vpack.c.bf16 %v849_v43, %v847_v50 }
 0x10f   : > { %v3122_v3 = vpop.f32.mrf.mxu3 }
 0x111   : > { %v851_v21 = vpop.f32.mrf.mxu0 }
 0x112   : > { %v852_v34 = vadd.f32 %v851_v21, %v3021_v29 }
 0x114   : > { %v3071_v22 = vpop.f32.mrf.mxu1 }
 0x117   : > { %v3131_v15 = vpop.f32.mrf.mxu3 }
 0x119   : > { %v853_v35 = vpop.f32.mrf.mxu0 }
 0x11a   : > { %v854_v36 = vadd.f32 %v853_v35, %v3021_v29  ;;  %994 = vmatmul.bf16.gmra.mxu2 %v2952_v60 }
 0x11c   : > { %v3075_v55 = vpop.f32.mrf.mxu1  ;;  %v1012_v39 = vpack.c.bf16 %v854_v36, %v852_v34 }
 0x11f   : > { %v3138_v59 = vpop.f32.mrf.mxu3 }
 0x121   : > { %v856_v24 = vpop.f32.mrf.mxu0 }
 0x122   : > { %v857_v37 = vadd.f32 %v856_v24, %v3021_v29 }
 0x124   : > { %v3080_v26 = vpop.f32.mrf.mxu1 }
 0x125   : > { %v897_v60 = vadd.f32 %v3080_v26, %v3021_v29  ;;  %v564_v26 = vadd.f32 %v3109_v42, %v3077_v44 }
 0x127   : > { %v3201_v18 = vpack.c.bf16 %v566_v53, %v564_v26  ;;  %v581_v53 = vadd.f32 %v3109_v42, %v3131_v15 }
 0x129   : > { %v858_v28 = vpop.f32.mrf.mxu0 }
 0x12a   : > { %v859_v47 = vadd.f32 %v858_v28, %v3021_v29  ;;  %v554_v28 = vadd.f32 %v3109_v42, %v2997_v19  ;;  %999 = vmatmul.bf16.gmra.mxu2 %v2965_v2 }
 0x12c   : > { %v3088_v31 = vpop.f32.mrf.mxu1  ;;  %v1013_v32 = vpack.c.bf16 %v859_v47, %v857_v37  ;;  %v3147_v37 = vpop.f32.mrf.mxu3  ;;  %v556_v47 = vadd.f32 %v3109_v42, %v3023_v30 }
 0x12d   : > { %v586_v15 = vadd.f32 %v3109_v42, %v3147_v37 }
 0x12e   : > { %1046 = vmatpush.bf16.xpose.msrb.mxu3 %v1013_v32  ;;  %v3154_v32 = vpop.f32.mrf.mxu2  ;;  %v3157_v36 = vpack.c.bf16 %v556_v47, %v554_v28 }
 0x134   : > { %v3094_v40 = vpop.f32.mrf.mxu1  ;;  %v3161_v54 = vpop.f32.mrf.mxu3 }
 0x135   : > { %v902_v30 = vadd.f32 %v3094_v40, %v3021_v29 }
 0x136   : > { %1047 = vmatpush.bf16.xpose.msrb.mxu3 %v1012_v39  ;;  %v3163_v43 = vpop.f32.mrf.mxu2 }
 0x13a   : > { %1004 = vmatmul.bf16.gmra.mxu2 %v3000_v20 }
 0x13c   : > { %v903_v49 = vpop.f32.mrf.mxu1  ;;  %v3175_v12 = vpop.f32.mrf.mxu3 }
 0x13d   : > { %v904_v19 = vadd.f32 %v903_v49, %v3021_v29  ;;  %v899_v49 = vadd.f32 %v3088_v31, %v3021_v29  ;;  %v892_v31 = vadd.f32 %v3071_v22, %v3021_v29 }
 0x13e   : > { %1048 = vmatpush.bf16.xpose.msrb.mxu3 %v1011_v52 }
 0x13f   : > { %v1022_v52 = vpack.c.bf16 %v904_v19, %v902_v30  ;;  %v1021_v40 = vpack.c.bf16 %v899_v49, %v897_v60  ;;  %v576_v19 = vadd.f32 %v3109_v42, %v3118_v14 }
 0x144   : > { %v906_v7 = vpop.f32.mrf.mxu1 }
 0x145   : > { %v907_v39 = vadd.f32 %v906_v7, %v3021_v29  ;;  %v3173_v7 = vpop.f32.mrf.mxu0 }
 0x146   : > { %1049 = vmatpush.bf16.xpose.msrb.mxu3 %v1010_v8  ;;  %v955_v8 = vpop.f32.mrf.mxu2 }
 0x14c   : > { %v908_v9 = vpop.f32.mrf.mxu1 }
 0x14d   : > { %1050 = vmatmul.bf16.vlgmr.msrb.gmra.mxu3 %v3116_v13  ;;  %v909_v34 = vadd.f32 %v908_v9, %v3021_v29  ;;  %v3184_v61 = vpop.f32.mrf.mxu0  ;;  %v894_v9 = vadd.f32 %v3075_v55, %v3021_v29  ;;  %v889_v55 = vadd.f32 %v3066_v17, %v3021_v29 }
 0x14e   : > { %v957_v57 = vpop.f32.mrf.mxu2 }
 0x14f   : > { %v1023_v50 = vpack.c.bf16 %v909_v34, %v907_v39  ;;  %v1020_v45 = vpack.c.bf16 %v894_v9, %v892_v31  ;;  %v1019_v2 = vpack.c.bf16 %v889_v55, %v887_v48 }
 0x154   : > { %v911_v33 = vpop.f32.mrf.mxu1 }
 0x155   : > { %v912_v1 = vadd.f32 %v911_v33, %v3021_v29  ;;  %v3188_v33 = vpop.f32.mrf.mxu3 }
 0x15c   : > { %v913_v63 = vpop.f32.mrf.mxu1 }
 0x15d   : > { %1055 = vmatmul.bf16.gmra.mxu3 %v3128_v56  ;;  %v914_v51 = vadd.f32 %v913_v63, %v3021_v29  ;;  %v935_v63 = vpop.f32.mrf.mxu0  ;;  %v3203_v22 = vpop.f32.mrf.mxu3 }
 0x15e   : > { %v596_v37 = vadd.f32 %v3109_v42, %v3203_v22 }
 0x15f   : > { %v1024_v10 = vpack.c.bf16 %v914_v51, %v912_v1 }
 0x164   : > { %v916_v16 = vpop.f32.mrf.mxu1 }
 0x165   : > { %v917_v35 = vadd.f32 %v916_v16, %v3021_v29  ;;  %v960_v16 = vpop.f32.mrf.mxu2  ;;  %v937_v44 = vpop.f32.mrf.mxu0 }
 0x166   : > { %v3211_v41 = vpop.f32.mrf.mxu3 }
 0x16c   : > { %v918_v21 = vpop.f32.mrf.mxu1 }
 0x16d   : > { %v919_v23 = vadd.f32 %v918_v21, %v3021_v29  ;;  %1060 = vmatmul.bf16.gmra.mxu3 %v3140_v62  ;;  %v962_v21 = vpop.f32.mrf.mxu2  ;;  %v940_v51 = vpop.f32.mrf.mxu0 }
 0x16e   : > { %v3226_v28 = vpop.f32.mrf.mxu3 }
 0x16f   : > { %v1025_v24 = vpack.c.bf16 %v919_v23, %v917_v35  ;;  %v882_v35 = vadd.f32 %v3043_v5, %v3021_v29  ;;  %v569_v23 = vadd.f32 %v3109_v42, %v3092_v38 }
 0x171   : > { %1131 = vmatpush.bf16.xpose.msrb.mxu0 %v1025_v24  ;;  %v1018_v17 = vpack.c.bf16 %v884_v27, %v882_v35  ;;  %v571_v24 = vadd.f32 %v3109_v42, %v3099_v46  ;;  %v589_v27 = vadd.f32 %v3109_v42, %v3161_v54 }
 0x173   : > { %v3220_v11 = vpack.c.bf16 %v571_v24, %v569_v23 }
 0x175   : > { %v965_v1 = vpop.f32.mrf.mxu2  ;;  %v942_v29 = vpop.f32.mrf.mxu0 }
 0x179   : > { %1132 = vmatpush.bf16.xpose.msrb.mxu0 %v1024_v10  ;;  %v3218_v10 = vperm.slane %v3012_v25, 1 }
 0x17b   : > { %v966_v20 = vadd.f32 %v965_v1, %v3218_v10  ;;  %v961_v46 = vadd.f32 %v960_v16, %v3218_v10  ;;  %v963_v47 = vadd.f32 %v962_v21, %v3218_v10  ;;  %v956_v34 = vadd.f32 %v955_v8, %v3218_v10  ;;  %v603_v8 = vpop.f32.mrf.mxu3 }
 0x17c   : > { %v958_v39 = vadd.f32 %v957_v57, %v3218_v10  ;;  %v953_v58 = vadd.f32 %v3163_v43, %v3218_v10  ;;  %v943_v43 = vadd.f32 %v942_v29, %v3218_v10  ;;  %v936_v31 = vadd.f32 %v935_v63, %v3218_v10 }
 0x17d   : > { %1065 = vmatmul.bf16.gmra.mxu3 %v3157_v36  ;;  %v967_v5 = vpop.f32.mrf.mxu2  ;;  %v945_v30 = vpop.f32.mrf.mxu0  ;;  %v931_v16 = vadd.f32 %v3173_v7, %v3218_v10  ;;  %v933_v55 = vadd.f32 %v3184_v61, %v3218_v10  ;;  %v604_v1 = vadd.f32 %v3109_v42, %v603_v8 }
 0x17e   : > { %v968_v38 = vadd.f32 %v967_v5, %v3218_v10  ;;  %v1031_v0 = vpack.c.bf16 %v958_v39, %v956_v34 }
 0x17f   : > { %v1026_v63 = vpack.c.bf16 %v933_v55, %v931_v16 }
 0x180   : > { %v1033_v25 = vpack.c.bf16 %v968_v38, %v966_v20 }
 0x181   : > { %1133 = vmatpush.bf16.xpose.msrb.mxu0 %v1023_v50  ;;  %v1032_v50 = vpack.c.bf16 %v963_v47, %v961_v46 }
 0x182   : > { %1732 = vmatpush.bf16.msrb.mxu1 %v1033_v25 }
 0x183   : > { %v605_v9 = vpop.f32.mrf.mxu3 }
 0x185   : > { %v947_v60 = vpop.f32.mrf.mxu0  ;;  %v3288_v22 = vpop.f32.mrf.mxu2 }
 0x186   : > { %1733 = vmatpush.bf16.msrb.mxu1 %v1032_v50 }
 0x189   : > { %1134 = vmatpush.bf16.xpose.msrb.mxu0 %v1022_v52  ;;  %v951_v52 = vadd.f32 %v3154_v32, %v3218_v10  ;;  %v941_v32 = vadd.f32 %v940_v51, %v3218_v10 }
 0x18a   : > { %1734 = vmatpush.bf16.msrb.mxu1 %v1031_v0 }
 0x18b   : > { %v1030_v14 = vpack.c.bf16 %v953_v58, %v951_v52  ;;  %v1028_v26 = vpack.c.bf16 %v943_v43, %v941_v32 }
 0x18d   : > { %1070 = vmatmul.bf16.gmra.mxu3 %v3179_v4 }
 0x18e   : > { %1735 = vmatpush.bf16.msrb.mxu1 %v1030_v14 }
 0x191   : > { %1135 = vmatpush.bf16.xpose.msrb.mxu0 %v1021_v40  ;;  %v948_v40 = vadd.f32 %v947_v60, %v3218_v10 }
 0x199   : > { %1136 = vmatpush.bf16.xpose.msrb.mxu0 %v1020_v45  ;;  %v938_v45 = vadd.f32 %v937_v44, %v3218_v10  ;;  %v608_v44 = vpop.f32.mrf.mxu3 }
 0x19b   : > { %v1027_v48 = vpack.c.bf16 %v938_v45, %v936_v31 }
 0x19d   : > { %1075 = vmatmul.bf16.gmra.mxu3 %v3201_v18 }
 0x1a1   : > { %1137 = vmatpush.bf16.xpose.msrb.mxu0 %v1019_v2  ;;  %v610_v21 = vpop.f32.mrf.mxu3 }
 0x1a9   : > { %1138 = vmatpush.bf16.xpose.msrb.mxu0 %v1018_v17  ;;  %v613_v61 = vpop.f32.mrf.mxu3 }
 0x1aa   : > { %v614_v52 = vadd.f32 %v3109_v42, %v613_v61 }
 0x1ad   : > { %1080 = vmatmul.bf16.gmra.mxu3 %v3220_v11 }
 0x1b0   : > { %1139 = vmatmul.bf16.vlgmr.msrb.gmra.mxu0 %v3116_v13  ;;  %v574_v13 = vadd.f32 %v3109_v42, %v3104_v6  ;;  %v946_v6 = vadd.f32 %v945_v30, %v3218_v10 }
 0x1b1   : > { %v615_v17 = vpop.f32.mrf.mxu3 }
 0x1b2   : > { %v3240_v49 = vpack.c.bf16 %v576_v19, %v574_v13  ;;  %v1029_v57 = vpack.c.bf16 %v948_v40, %v946_v6  ;;  %v616_v58 = vadd.f32 %v3109_v42, %v615_v17 }
 0x1b4   : > { %1736 = vmatpush.bf16.msrb.mxu1 %v1029_v57  ;;  %v633_v0 = vpack.c.bf16 %v616_v58, %v614_v52 }
 0x1b8   : > { %1737 = vmatpush.bf16.msrb.mxu1 %v1028_v26 }
 0x1bc   : > { %1738 = vmatpush.bf16.msrb.mxu1 %v1027_v48 }
 0x1bd   : > { %1085 = vmatmul.bf16.gmra.mxu3 %v3240_v49 }
 0x1c0   : > { %1144 = vmatmul.bf16.gmra.mxu0 %v3128_v56  ;;  %v579_v56 = vadd.f32 %v3109_v42, %v3122_v3  ;;  %1739 = vmatpush.bf16.msrb.mxu1 %v1026_v63  ;;  %v584_v3 = vadd.f32 %v3109_v42, %v3138_v59  ;;  %v594_v59 = vadd.f32 %v3109_v42, %v3188_v33 }
 0x1c2   : > { %v626_v2 = vpack.c.bf16 %v581_v53, %v579_v56  ;;  %v627_v7 = vpack.c.bf16 %v586_v15, %v584_v3 }
 0x1cd   : > { %1090 = vmatmul.bf16.gmra.mxu3 %v626_v2 }
 0x1d0   : > { %1149 = vmatmul.bf16.gmra.mxu0 %v3140_v62  ;;  %v591_v62 = vadd.f32 %v3109_v42, %v3175_v12  ;;  %v3273_v23 = vpop.f32.mrf.mxu3  ;;  %v599_v12 = vadd.f32 %v3109_v42, %v3211_v41  ;;  %v606_v41 = vadd.f32 %v3109_v42, %v605_v9 }
 0x1d2   : > { %v628_v35 = vpack.c.bf16 %v591_v62, %v589_v27  ;;  %v631_v20 = vpack.c.bf16 %v606_v41, %v604_v1 }
 0x1d8   : > { %v3276_v54 = vpop.f32.mrf.mxu3 }
 0x1dd   : > { %1095 = vmatmul.bf16.gmra.mxu3 %v627_v7 }
 0x1e0   : > { %1154 = vmatmul.bf16.gmra.mxu0 %v3157_v36  ;;  %v629_v36 = vpack.c.bf16 %v596_v37, %v594_v59  ;;  %v3284_v33 = vpop.f32.mrf.mxu3 }
 0x1e8   : > { %v3290_v51 = vpop.f32.mrf.mxu3 }
 0x1ed   : > { %1100 = vmatmul.bf16.gmra.mxu3 %v628_v35 }
 0x1f0   : > { %1159 = vmatmul.bf16.gmra.mxu0 %v3179_v4  ;;  %v601_v4 = vadd.f32 %v3109_v42, %v3226_v28  ;;  %v3299_v5 = vpop.f32.mrf.mxu3  ;;  %v611_v28 = vadd.f32 %v3109_v42, %v610_v21 }
 0x1f2   : > { %v3282_v24 = vpack.c.bf16 %v601_v4, %v599_v12 }
 0x1f8   : > { %v3305_v46 = vpop.f32.mrf.mxu3 }
 0x1fd   : > { %1105 = vmatmul.bf16.gmra.mxu3 %v629_v36 }
 0x200   : > { %1164 = vmatmul.bf16.gmra.mxu0 %v3201_v18  ;;  %v3292_v18 = vpop.f32.mrf.mxu2  ;;  %v3313_v50 = vpop.f32.mrf.mxu3 }
 0x208   : > { %v3297_v29 = vpop.f32.mrf.mxu2  ;;  %v3325_v6 = vpop.f32.mrf.mxu3 }
 0x20d   : > { %1110 = vmatmul.bf16.gmra.mxu3 %v3282_v24 }
 0x210   : > { %1169 = vmatmul.bf16.gmra.mxu0 %v3220_v11  ;;  %v3301_v38 = vpop.f32.mrf.mxu2  ;;  %v609_v11 = vadd.f32 %v3109_v42, %v608_v44 }
 0x212   : > { %v632_v47 = vpack.c.bf16 %v611_v28, %v609_v11 }
 0x218   : > { %v3311_v39 = vpop.f32.mrf.mxu2 }
 0x219   : > { %v981_v11 = vadd.f32 %v3311_v39, %v3218_v10  ;;  %v978_v39 = vadd.f32 %v3301_v38, %v3218_v10 }
 0x21d   : > { %1115 = vmatmul.bf16.gmra.mxu3 %v631_v20 }
 0x220   : > { %1174 = vmatmul.bf16.gmra.mxu0 %v3240_v49  ;;  %v982_v30 = vpop.f32.mrf.mxu2 }
 0x221   : > { %v983_v28 = vadd.f32 %v982_v30, %v3218_v10 }
 0x223   : > { %v1036_v52 = vpack.c.bf16 %v983_v28, %v981_v11 }
 0x228   : > { %v985_v14 = vpop.f32.mrf.mxu2 }
 0x229   : > { %v986_v41 = vadd.f32 %v985_v14, %v3218_v10 }
 0x22d   : > { %v3307_v25 = vpop.f32.mrf.mxu0  ;;  %1120 = vmatmul.bf16.gmra.mxu3 %v632_v47 }
 0x22e   : > { %v1220_v34 = vmax.f32 %v3273_v23, %v3307_v25 }
 0x230   : > { %1179 = vmatmul.bf16.gmra.mxu0 %v626_v2  ;;  %1221 = vmax.xlane.f32.xlu0 %v1220_v34  ;;  %v987_v32 = vpop.f32.mrf.mxu2  ;;  %v3347_v2 = vpop.f32.mrf.mxu3 }
 0x235   : > { %v3315_v13 = vpop.f32.mrf.mxu0 }
 0x236   : > { %v1223_v19 = vmax.f32 %v3276_v54, %v3315_v13 }
 0x238   : > { %1224 = vmax.xlane.f32.xlu0 %v1223_v19  ;;  %v990_v57 = vpop.f32.mrf.mxu2  ;;  %v3371_v14 = vpop.f32.mrf.mxu3 }
 0x239   : > { %v991_v12 = vadd.f32 %v990_v57, %v3218_v10 }
 0x23d   : > { %v3321_v49 = vpop.f32.mrf.mxu0  ;;  %1125 = vmatmul.bf16.gmra.mxu3 %v633_v0 }
 0x23e   : > { %v1226_v8 = vmax.f32 %v3284_v33, %v3321_v49 }
 0x240   : > { %1184 = vmatmul.bf16.gmra.mxu0 %v627_v7  ;;  %1227 = vmax.xlane.f32.xlu1 %v1226_v8  ;;  %v992_v45 = vpop.f32.mrf.mxu2 }
 0x241   : > { %v993_v4 = vadd.f32 %v992_v45, %v3218_v10 }
 0x243   : > { %v1038_v1 = vpack.c.bf16 %v993_v4, %v991_v12 }
 0x245   : > { %v3327_v60 = vpop.f32.mrf.mxu0 }
 0x246   : > { %v1229_v40 = vmax.f32 %v3290_v51, %v3327_v60 }
 0x248   : > { %1230 = vmax.xlane.f32.xlu1 %v1229_v40  ;;  %v995_v53 = vpop.f32.mrf.mxu2  ;;  %v976_v40 = vadd.f32 %v3297_v29, %v3218_v10 }
 0x249   : > { %v996_v37 = vadd.f32 %v995_v53, %v3218_v10 }
 0x24d   : > { %v3331_v42 = vpop.f32.mrf.mxu0 }
 0x24e   : > { %v1232_v43 = vmax.f32 %v3299_v5, %v3331_v42 }
 0x250   : > { %1189 = vmatmul.bf16.gmra.mxu0 %v628_v35  ;;  %1233 = vmax.xlane.f32.xlu2 %v1232_v43  ;;  %v997_v48 = vpop.f32.mrf.mxu2  ;;  %v973_v43 = vadd.f32 %v3292_v18, %v3218_v10 }
 0x255   : > { %v3335_v9 = vpop.f32.mrf.mxu0 }
 0x256   : > { %v1235_v31 = vmax.f32 %v3305_v46, %v3335_v9 }
 0x258   : > { %1236 = vmax.xlane.f32.xlu2 %v1235_v31  ;;  %v1000_v3 = vpop.f32.mrf.mxu2 }
 0x259   : > { %v1001_v62 = vadd.f32 %v1000_v3, %v3218_v10 }
 0x25d   : > { %v3339_v26 = vpop.f32.mrf.mxu0 }
 0x25e   : > { %v1238_v56 = vmax.f32 %v3313_v50, %v3339_v26 }
 0x260   : > { %1194 = vmatmul.bf16.gmra.mxu0 %v629_v36  ;;  %1239 = vmax.xlane.f32.xlu0 %v1238_v56  ;;  %v1002_v15 = vpop.f32.mrf.mxu2  ;;  %v998_v36 = vadd.f32 %v997_v48, %v3218_v10 }
 0x261   : > { %v1003_v35 = vadd.f32 %v1002_v15, %v3218_v10 }
 0x263   : > { %v1040_v59 = vpack.c.bf16 %v1003_v35, %v1001_v62 }
 0x265   : > { %v3343_v16 = vpop.f32.mrf.mxu0 }
 0x266   : > { %v1241_v55 = vmax.f32 %v3325_v6, %v3343_v16 }
 0x268   : > { %1242 = vmax.xlane.f32.xlu1 %v1241_v55  ;;  %v1005_v21 = vpop.f32.mrf.mxu2 }
 0x269   : > { %v1006_v61 = vadd.f32 %v1005_v21, %v3218_v10 }
 0x26d   : > { %v3349_v63 = vpop.f32.mrf.mxu0 }
 0x26e   : > { %v1244_v44 = vmax.f32 %v3347_v2, %v3349_v63 }
 0x270   : > { %1199 = vmatmul.bf16.gmra.mxu0 %v3282_v24  ;;  %1245 = vmax.xlane.f32.xlu1 %v1244_v44  ;;  %v1007_v7 = vpop.f32.mrf.mxu2  ;;  %v1039_v24 = vpack.c.bf16 %v998_v36, %v996_v37 }
 0x271   : > { %v1008_v27 = vadd.f32 %v1007_v7, %v3218_v10 }
 0x273   : > { %v1041_v17 = vpack.c.bf16 %v1008_v27, %v1006_v61 }
 0x275   : > { %1821 = vmatpush.bf16.msrb.mxu2 %v1041_v17  ;;  %v3367_v34 = vpop.f32.mrf.mxu0 }
 0x276   : > { %v1247_v61 = vmax.f32 %v3371_v14, %v3367_v34 }
 0x279   : > { %1822 = vmatpush.bf16.msrb.mxu2 %v1040_v59 }
 0x27d   : > { %1823 = vmatpush.bf16.msrb.mxu2 %v1039_v24  ;;  %v3383_v38 = vpop.f32.mrf.mxu0 }
 0x280   : > { %1204 = vmatmul.bf16.gmra.mxu0 %v631_v20  ;;  %v988_v20 = vadd.f32 %v987_v32, %v3218_v10  ;;  %v971_v32 = vadd.f32 %v3288_v22, %v3218_v10  ;;  %v3389_v10 = vpop.f32.mrf.mxu3 }
 0x281   : > { %1824 = vmatpush.bf16.msrb.mxu2 %v1038_v1  ;;  %v1250_v12 = vmax.f32 %v3389_v10, %v3383_v38 }
 0x282   : > { %v1034_v57 = vpack.c.bf16 %v973_v43, %v971_v32 }
 0x285   : > { %v3399_v21 = vpop.f32.mrf.mxu0 }
 0x288   : > { %v3405_v27 = vpop.f32.mrf.mxu3 }
 0x28d   : > { %v3417_v4 = vpop.f32.mrf.mxu0 }
 0x290   : > { %1209 = vmatmul.bf16.gmra.mxu0 %v632_v47  ;;  %v1037_v47 = vpack.c.bf16 %v988_v20, %v986_v41 }
 0x292   : > { %1825 = vmatpush.bf16.msrb.mxu2 %v1037_v47 }
 0x296   : > { %1826 = vmatpush.bf16.msrb.mxu2 %v1036_v52  ;;  %v3431_v52 = vpop.f32.mrf.mxu0 }
 0x2a0   : > { %1214 = vmatmul.bf16.gmra.mxu0 %v633_v0 }
 0x2a3   : > { %v1222_v19 = vpop.xlane.xlu0 %1221 }
 0x2a4   : > { %v1316_v58 = vsub.f32 %v3273_v23, %v1222_v19  ;;  %v1317_v8 = vsub.f32 %v3307_v25, %v1222_v19  ;;  %v1035_v23 = vpack.c.bf16 %v978_v39, %v976_v40  ;;  %v1253_v19 = vmax.f32 %v3405_v27, %v3399_v21 }
 0x2a6   : > { %v1380_v30 = vmul.f32 1.442695, %v1316_v58  ;;  %v1382_v0 = vmul.f32 1.442695, %v1317_v8  ;;  %1827 = vmatpush.bf16.msrb.mxu2 %v1035_v23 }
 0x2a8   : > { %2431 = vpow2.f32 %v1380_v30 }
 0x2a9   : > { %2433 = vpow2.f32 %v1382_v0 }
 0x2aa   : > { %1828 = vmatpush.bf16.msrb.mxu2 %v1034_v57 }
 0x2ab   : > { %v1225_v25 = vpop.xlane.xlu0 %1224 }
 0x2ac   : > { %v1318_v29 = vsub.f32 %v3276_v54, %v1225_v25  ;;  %v1319_v31 = vsub.f32 %v3315_v13, %v1225_v25  ;;  %v3447_v25 = vpop.f32.mrf.mxu0 }
 0x2ae   : > { %v3385_v45 = vpop.eup %2431  ;;  %v1384_v56 = vmul.f32 1.442695, %v1318_v29  ;;  %v1386_v22 = vmul.f32 1.442695, %v1319_v31 }
 0x2af   : > { %v3387_v53 = vpop.eup %2433 }
 0x2b0   : > { %2435 = vpow2.f32 %v1384_v56  ;;  %v1508_v18 = vadd.f32 %v3387_v53, %v3385_v45 }
 0x2b1   : > { %2437 = vpow2.f32 %v1386_v22 }
 0x2b2   : > { %1509 = vadd.xlane.f32.xlu2 %v1508_v18 }
 0x2b3   : > { %v1228_v54 = vpop.xlane.xlu1 %1227 }
 0x2b4   : > { %v1320_v13 = vsub.f32 %v3284_v33, %v1228_v54  ;;  %v1321_v55 = vsub.f32 %v3321_v49, %v1228_v54 }
 0x2b6   : > { %v3395_v48 = vpop.eup %2435  ;;  %v1388_v44 = vmul.f32 1.442695, %v1320_v13  ;;  %v1390_v3 = vmul.f32 1.442695, %v1321_v55 }
 0x2b7   : > { %v3397_v15 = vpop.eup %2437 }
 0x2b8   : > { %2439 = vpow2.f32 %v1388_v44  ;;  %v1511_v7 = vadd.f32 %v3397_v15, %v3395_v48 }
 0x2b9   : > { %2441 = vpow2.f32 %v1390_v3 }
 0x2ba   : > { %1512 = vadd.xlane.f32.xlu0 %v1511_v7  ;;  %1248 = vmax.xlane.f32.xlu2 %v1247_v61  ;;  %v3465_v61 = vpop.f32.mrf.mxu0 }
 0x2bb   : > { %v1231_v33 = vpop.xlane.xlu1 %1230 }
 0x2bc   : > { %v1322_v49 = vsub.f32 %v3290_v51, %v1231_v33  ;;  %v1323_v62 = vsub.f32 %v3327_v60, %v1231_v33  ;;  %v3419_v51 = vpop.f32.mrf.mxu3 }
 0x2bd   : > { %v1256_v43 = vmax.f32 %v3419_v51, %v3417_v4 }
 0x2be   : > { %v3409_v35 = vpop.eup %2439  ;;  %v1392_v17 = vmul.f32 1.442695, %v1322_v49  ;;  %v1394_v59 = vmul.f32 1.442695, %v1323_v62 }
 0x2bf   : > { %v3411_v37 = vpop.eup %2441 }
 0x2c0   : > { %2443 = vpow2.f32 %v1392_v17  ;;  %v1514_v36 = vadd.f32 %v3411_v37, %v3409_v35 }
 0x2c1   : > { %2445 = vpow2.f32 %v1394_v59 }
 0x2c2   : > { %1515 = vadd.xlane.f32.xlu0 %v1514_v36  ;;  %1251 = vmax.xlane.f32.xlu2 %v1250_v12 }
 0x2c3   : > { %v1234_v60 = vpop.xlane.xlu2 %1233 }
 0x2c4   : > { %v1324_v24 = vsub.f32 %v3299_v5, %v1234_v60  ;;  %v1325_v1 = vsub.f32 %v3331_v42, %v1234_v60  ;;  %v3435_v8 = vpop.f32.mrf.mxu3 }
 0x2c5   : > { %v1259_v54 = vmax.f32 %v3435_v8, %v3431_v52 }
 0x2c6   : > { %v3423_v41 = vpop.eup %2443  ;;  %v1396_v20 = vmul.f32 1.442695, %v1324_v24  ;;  %v1398_v11 = vmul.f32 1.442695, %v1325_v1 }
 0x2c7   : > { %v3425_v28 = vpop.eup %2445 }
 0x2c8   : > { %2447 = vpow2.f32 %v1396_v20  ;;  %v1517_v47 = vadd.f32 %v3425_v28, %v3423_v41  ;;  %v3483_v20 = vpop.f32.mrf.mxu0 }
 0x2c9   : > { %2449 = vpow2.f32 %v1398_v11 }
 0x2ca   : > { %1518 = vadd.xlane.f32.xlu1 %v1517_v47  ;;  %1254 = vmax.xlane.f32.xlu0 %v1253_v19 }
 0x2cb   : > { %v1237_v5 = vpop.xlane.xlu2 %1236 }
 0x2cc   : > { %v1326_v42 = vsub.f32 %v3305_v46, %v1237_v5  ;;  %v1327_v58 = vsub.f32 %v3335_v9, %v1237_v5  ;;  %v3453_v22 = vpop.f32.mrf.mxu3 }
 0x2cd   : > { %v1262_v49 = vmax.f32 %v3453_v22, %v3447_v25 }
 0x2ce   : > { %v3437_v40 = vpop.eup %2447  ;;  %v1400_v39 = vmul.f32 1.442695, %v1326_v42  ;;  %v1402_v30 = vmul.f32 1.442695, %v1327_v58 }
 0x2cf   : > { %v3439_v0 = vpop.eup %2449 }
 0x2d0   : > { %2451 = vpow2.f32 %v1400_v39  ;;  %v1520_v32 = vadd.f32 %v3439_v0, %v3437_v40  ;;  %v3495_v5 = vpop.f32.mrf.mxu0 }
 0x2d1   : > { %2453 = vpow2.f32 %v1402_v30 }
 0x2d2   : > { %1521 = vadd.xlane.f32.xlu1 %v1520_v32  ;;  %1257 = vmax.xlane.f32.xlu0 %v1256_v43 }
 0x2d3   : > { %v1240_v46 = vpop.xlane.xlu0 %1239 }
 0x2d4   : > { %v1328_v9 = vsub.f32 %v3313_v50, %v1240_v46  ;;  %v1329_v23 = vsub.f32 %v3339_v26, %v1240_v46  ;;  %v3471_v62 = vpop.f32.mrf.mxu3 }
 0x2d5   : > { %v1265_v1 = vmax.f32 %v3471_v62, %v3465_v61 }
 0x2d6   : > { %v3449_v57 = vpop.eup %2451  ;;  %v1404_v29 = vmul.f32 1.442695, %v1328_v9  ;;  %v1406_v31 = vmul.f32 1.442695, %v1329_v23 }
 0x2d7   : > { %v3451_v56 = vpop.eup %2453 }
 0x2d8   : > { %2455 = vpow2.f32 %v1404_v29  ;;  %v1523_v18 = vadd.f32 %v3451_v56, %v3449_v57  ;;  %v3501_v39 = vpop.f32.mrf.mxu0 }
 0x2d9   : > { %2457 = vpow2.f32 %v1406_v31 }
 0x2da   : > { %1524 = vadd.xlane.f32.xlu2 %v1523_v18  ;;  %1260 = vmax.xlane.f32.xlu1 %v1259_v54 }
 0x2db   : > { %v1243_v50 = vpop.xlane.xlu1 %1242 }
 0x2dc   : > { %v1330_v26 = vsub.f32 %v3325_v6, %v1243_v50  ;;  %v1331_v13 = vsub.f32 %v3343_v16, %v1243_v50 }
 0x2de   : > { %v3461_v55 = vpop.eup %2455  ;;  %v1408_v44 = vmul.f32 1.442695, %v1330_v26  ;;  %v1410_v3 = vmul.f32 1.442695, %v1331_v13 }
 0x2df   : > { %v3463_v7 = vpop.eup %2457 }
 0x2e0   : > { %2459 = vpow2.f32 %v1408_v44  ;;  %v1526_v33 = vadd.f32 %v3463_v7, %v3461_v55  ;;  %v3509_v26 = vpop.f32.mrf.mxu0 }
 0x2e1   : > { %2461 = vpow2.f32 %v1410_v3 }
 0x2e2   : > { %1527 = vadd.xlane.f32.xlu2 %v1526_v33  ;;  %1263 = vmax.xlane.f32.xlu1 %v1262_v49 }
 0x2e3   : > { %v1246_v6 = vpop.xlane.xlu1 %1245 }
 0x2e4   : > { %v1332_v16 = vsub.f32 %v3347_v2, %v1246_v6  ;;  %v1333_v17 = vsub.f32 %v3349_v63, %v1246_v6  ;;  %v3485_v2 = vpop.f32.mrf.mxu3 }
 0x2e5   : > { %v1268_v19 = vmax.f32 %v3485_v2, %v3483_v20 }
 0x2e6   : > { %v3475_v59 = vpop.eup %2459  ;;  %v1412_v36 = vmul.f32 1.442695, %v1332_v16  ;;  %v1414_v12 = vmul.f32 1.442695, %v1333_v17 }
 0x2e7   : > { %v3477_v60 = vpop.eup %2461 }
 0x2e8   : > { %2463 = vpow2.f32 %v1412_v36  ;;  %v1529_v24 = vadd.f32 %v3477_v60, %v3475_v59 }
 0x2e9   : > { %2465 = vpow2.f32 %v1414_v12 }
 0x2ea   : > { %1530 = vadd.xlane.f32.xlu0 %v1529_v24  ;;  %1266 = vmax.xlane.f32.xlu2 %v1265_v1 }
 0x2ec   : > { %v3497_v42 = vpop.f32.mrf.mxu3 }
 0x2ed   : > { %v1271_v58 = vmax.f32 %v3497_v42, %v3495_v5 }
 0x2ee   : > { %v3487_v63 = vpop.eup %2463 }
 0x2ef   : > { %v3489_v11 = vpop.eup %2465 }
 0x2f0   : > { %v1532_v47 = vadd.f32 %v3489_v11, %v3487_v63 }
 0x2f2   : > { %1533 = vadd.xlane.f32.xlu0 %v1532_v47  ;;  %1269 = vmax.xlane.f32.xlu2 %v1268_v19 }
 0x2f4   : > { %v3503_v30 = vpop.f32.mrf.mxu3 }
 0x2f5   : > { %v1274_v32 = vmax.f32 %v3503_v30, %v3501_v39 }
 0x2fa   : > { %1272 = vmax.xlane.f32.xlu0 %v1271_v58 }
 0x2fc   : > { %v3515_v6 = vpop.f32.mrf.mxu3 }
 0x302   : > { %1275 = vmax.xlane.f32.xlu0 %v1274_v32 }
 0x304   : > { %v3531_v58 = vpop.f32.mrf.mxu3 }
 0x325   : > { %v1510_v43 = vpop.xlane.xlu2 %1509 }
 0x326   : > { %2467 = vrcp.f32 %v1510_v43 }
 0x32c   : > { %v2468_v54 = vpop.eup %2467 }
 0x32d   : > { %v1513_v46 = vpop.xlane.xlu0 %1512  ;;  %v1249_v9 = vpop.xlane.xlu2 %1248  ;;  %v1636_v13 = vmul.f32 %v2468_v54, %v3385_v45  ;;  %v1637_v44 = vmul.f32 %v2468_v54, %v3387_v53 }
 0x32e   : > { %2469 = vrcp.f32 %v1513_v46  ;;  %v1334_v23 = vsub.f32 %v3371_v14, %v1249_v9  ;;  %v1335_v29 = vsub.f32 %v3367_v34, %v1249_v9 }
 0x330   : > { %v1416_v31 = vmul.f32 1.442695, %v1334_v23  ;;  %v1418_v18 = vmul.f32 1.442695, %v1335_v29 }
 0x332   : > { %2471 = vpow2.f32 %v1416_v31 }
 0x333   : > { %2473 = vpow2.f32 %v1418_v18 }
 0x334   : > { %v2470_v50 = vpop.eup %2469 }
 0x335   : > { %v1638_v3 = vmul.f32 %v2470_v50, %v3395_v48  ;;  %v1639_v33 = vmul.f32 %v2470_v50, %v3397_v15  ;;  %v1516_v49 = vpop.xlane.xlu0 %1515  ;;  %v1252_v14 = vpop.xlane.xlu2 %1251 }
 0x336   : > { %v1336_v34 = vsub.f32 %v3389_v10, %v1252_v14  ;;  %v1337_v16 = vsub.f32 %v3383_v38, %v1252_v14  ;;  %v3525_v38 = vpop.f32.mrf.mxu0 }
 0x337   : > { %v1700_v17 = vpack.c.bf16 %v1638_v3, %v1636_v13  ;;  %v1701_v36 = vpack.c.bf16 %v1639_v33, %v1637_v44 }
 0x338   : > { %v3519_v12 = vpop.eup %2471  ;;  %v1420_v24 = vmul.f32 1.442695, %v1336_v34  ;;  %v1422_v45 = vmul.f32 1.442695, %v1337_v16 }
 0x339   : > { %v3521_v1 = vpop.eup %2473  ;;  %1740 = vmatmul.bf16.vlgmr.msrb.gmra.mxu1 %v1700_v17  ;;  %1829 = vmatmul.bf16.vlgmr.msrb.gmra.mxu2 %v1701_v36 }
 0x33a   : > { %2475 = vpow2.f32 %v1420_v24  ;;  %v1535_v53 = vadd.f32 %v3521_v1, %v3519_v12 }
 0x33b   : > { %2477 = vpow2.f32 %v1422_v45 }
 0x33c   : > { %2479 = vrcp.f32 %v1516_v49  ;;  %1536 = vadd.xlane.f32.xlu1 %v1535_v53 }
 0x33d   : > { %v1519_v10 = vpop.xlane.xlu1 %1518  ;;  %v1255_v48 = vpop.xlane.xlu0 %1254 }
 0x33e   : > { %2481 = vrcp.f32 %v1519_v10  ;;  %v1338_v15 = vsub.f32 %v3405_v27, %v1255_v48  ;;  %v1339_v47 = vsub.f32 %v3399_v21, %v1255_v48  ;;  %v3545_v14 = vpop.f32.mrf.mxu0 }
 0x340   : > { %v3529_v19 = vpop.eup %2475  ;;  %v1424_v32 = vmul.f32 1.442695, %v1338_v15  ;;  %v1426_v43 = vmul.f32 1.442695, %v1339_v47 }
 0x341   : > { %v3533_v46 = vpop.eup %2477 }
 0x342   : > { %v2480_v9 = vpop.eup %2479  ;;  %2483 = vpow2.f32 %v1424_v32  ;;  %v1538_v23 = vadd.f32 %v3533_v46, %v3529_v19  ;;  %v1280_v32 = vmax.f32 %v3531_v58, %v3525_v38 }
 0x343   : > { %2485 = vpow2.f32 %v1426_v43  ;;  %v1640_v21 = vmul.f32 %v2480_v9, %v3409_v35  ;;  %v1641_v54 = vmul.f32 %v2480_v9, %v3411_v37  ;;  %v3549_v35 = vpop.f32.mrf.mxu3 }
 0x344   : > { %v2482_v29 = vpop.eup %2481  ;;  %1539 = vadd.xlane.f32.xlu1 %v1538_v23 }
 0x345   : > { %v1522_v31 = vpop.xlane.xlu1 %1521  ;;  %v1258_v27 = vpop.xlane.xlu0 %1257  ;;  %v1642_v18 = vmul.f32 %v2482_v29, %v3423_v41  ;;  %v1643_v50 = vmul.f32 %v2482_v29, %v3425_v28 }
 0x346   : > { %v1340_v13 = vsub.f32 %v3419_v51, %v1258_v27  ;;  %v1341_v44 = vsub.f32 %v3417_v4, %v1258_v27  ;;  %v1277_v4 = vmax.f32 %v3515_v6, %v3509_v26  ;;  %v3561_v15 = vpop.f32.mrf.mxu0 }
 0x347   : > { %v1702_v3 = vpack.c.bf16 %v1642_v18, %v1640_v21  ;;  %v1703_v33 = vpack.c.bf16 %v1643_v50, %v1641_v54 }
 0x348   : > { %v3543_v49 = vpop.eup %2483  ;;  %v1428_v34 = vmul.f32 1.442695, %v1340_v13  ;;  %v1430_v16 = vmul.f32 1.442695, %v1341_v44 }
 0x349   : > { %v3547_v17 = vpop.eup %2485  ;;  %1745 = vmatmul.bf16.gmra.mxu1 %v1702_v3  ;;  %1834 = vmatmul.bf16.gmra.mxu2 %v1703_v33 }
 0x34a   : > { %2487 = vpow2.f32 %v1428_v34  ;;  %v1541_v37 = vadd.f32 %v3547_v17, %v3543_v49 }
 0x34b   : > { %2489 = vpow2.f32 %v1430_v16  ;;  %v3567_v43 = vpop.f32.mrf.mxu3 }
 0x34c   : > { %2491 = vrcp.f32 %v1522_v31  ;;  %1542 = vadd.xlane.f32.xlu2 %v1541_v37  ;;  %1278 = vmax.xlane.f32.xlu1 %v1277_v4 }
 0x34d   : > { %v1525_v51 = vpop.xlane.xlu2 %1524  ;;  %v1261_v41 = vpop.xlane.xlu1 %1260 }
 0x34e   : > { %2493 = vrcp.f32 %v1525_v51  ;;  %v1342_v28 = vsub.f32 %v3435_v8, %v1261_v41  ;;  %v1343_v36 = vsub.f32 %v3431_v52, %v1261_v41 }
 0x350   : > { %v3557_v24 = vpop.eup %2487  ;;  %v1432_v45 = vmul.f32 1.442695, %v1342_v28  ;;  %v1434_v53 = vmul.f32 1.442695, %v1343_v36 }
 0x351   : > { %v3559_v10 = vpop.eup %2489 }
 0x352   : > { %v2492_v48 = vpop.eup %2491  ;;  %2495 = vpow2.f32 %v1432_v45  ;;  %v1544_v47 = vadd.f32 %v3559_v10, %v3557_v24  ;;  %v1286_v45 = vmax.f32 %v3567_v43, %v3561_v15 }
 0x353   : > { %2497 = vpow2.f32 %v1434_v53  ;;  %v1644_v23 = vmul.f32 %v2492_v48, %v3437_v40  ;;  %v1645_v31 = vmul.f32 %v2492_v48, %v3439_v0  ;;  %v1283_v0 = vmax.f32 %v3549_v35, %v3545_v14  ;;  %v3587_v16 = vpop.f32.mrf.mxu3 }
 0x354   : > { %v2494_v8 = vpop.eup %2493  ;;  %1545 = vadd.xlane.f32.xlu2 %v1544_v47  ;;  %1281 = vmax.xlane.f32.xlu1 %v1280_v32 }
 0x355   : > { %v1528_v52 = vpop.xlane.xlu2 %1527  ;;  %v1264_v9 = vpop.xlane.xlu1 %1263  ;;  %v1646_v29 = vmul.f32 %v2494_v8, %v3449_v57  ;;  %v1647_v27 = vmul.f32 %v2494_v8, %v3451_v56 }
 0x356   : > { %v1344_v21 = vsub.f32 %v3453_v22, %v1264_v9  ;;  %v1345_v18 = vsub.f32 %v3447_v25, %v1264_v9  ;;  %v3583_v57 = vpop.f32.mrf.mxu0 }
 0x357   : > { %v1704_v54 = vpack.c.bf16 %v1646_v29, %v1644_v23  ;;  %v1705_v50 = vpack.c.bf16 %v1647_v27, %v1645_v31 }
 0x358   : > { %v3575_v13 = vpop.eup %2495  ;;  %v1436_v44 = vmul.f32 1.442695, %v1344_v21  ;;  %v1438_v3 = vmul.f32 1.442695, %v1345_v18 }
 0x359   : > { %v3577_v33 = vpop.eup %2497  ;;  %1750 = vmatmul.bf16.gmra.mxu1 %v1704_v54  ;;  %1839 = vmatmul.bf16.gmra.mxu2 %v1705_v50 }
 0x35a   : > { %2499 = vpow2.f32 %v1436_v44  ;;  %v1547_v40 = vadd.f32 %v3577_v33, %v3575_v13 }
 0x35b   : > { %2501 = vpow2.f32 %v1438_v3 }
 0x35c   : > { %2503 = vrcp.f32 %v1528_v52  ;;  %1548 = vadd.xlane.f32.xlu0 %v1547_v40  ;;  %1284 = vmax.xlane.f32.xlu2 %v1283_v0 }
 0x35d   : > { %v1531_v25 = vpop.xlane.xlu0 %1530  ;;  %v1267_v56 = vpop.xlane.xlu2 %1266 }
 0x35e   : > { %2505 = vrcp.f32 %v1531_v25  ;;  %v1346_v22 = vsub.f32 %v3471_v62, %v1267_v56  ;;  %v1347_v34 = vsub.f32 %v3465_v61, %v1267_v56  ;;  %v3605_v23 = vpop.f32.mrf.mxu0 }
 0x360   : > { %v3589_v37 = vpop.eup %2499  ;;  %v1440_v4 = vmul.f32 1.442695, %v1346_v22  ;;  %v1442_v51 = vmul.f32 1.442695, %v1347_v34 }
 0x361   : > { %v3591_v41 = vpop.eup %2501 }
 0x362   : > { %v2504_v28 = vpop.eup %2503  ;;  %2507 = vpow2.f32 %v1440_v4  ;;  %v1550_v36 = vadd.f32 %v3591_v41, %v3589_v37 }
 0x363   : > { %2509 = vpow2.f32 %v1442_v51  ;;  %v1648_v48 = vmul.f32 %v2504_v28, %v3461_v55  ;;  %v1649_v32 = vmul.f32 %v2504_v28, %v3463_v7  ;;  %v3611_v55 = vpop.f32.mrf.mxu3 }
 0x364   : > { %v2506_v62 = vpop.eup %2505  ;;  %1551 = vadd.xlane.f32.xlu0 %v1550_v36  ;;  %1287 = vmax.xlane.f32.xlu2 %v1286_v45  ;;  %v1292_v56 = vmax.f32 %v3611_v55, %v3605_v23 }
 0x365   : > { %v3597_v61 = vpop.xlane.xlu0 %1533  ;;  %v1270_v53 = vpop.xlane.xlu2 %1269  ;;  %v1650_v47 = vmul.f32 %v2506_v62, %v3475_v59  ;;  %v1651_v8 = vmul.f32 %v2506_v62, %v3477_v60  ;;  %v1289_v59 = vmax.f32 %v3587_v16, %v3583_v57 }
 0x366   : > { %v1348_v52 = vsub.f32 %v3485_v2, %v1270_v53  ;;  %v1349_v9 = vsub.f32 %v3483_v20, %v1270_v53  ;;  %v3623_v0 = vpop.f32.mrf.mxu0 }
 0x367   : > { %v1706_v29 = vpack.c.bf16 %v1650_v47, %v1648_v48  ;;  %v1707_v31 = vpack.c.bf16 %v1651_v8, %v1649_v32 }
 0x368   : > { %v3607_v27 = vpop.eup %2507  ;;  %v1444_v21 = vmul.f32 1.442695, %v1348_v52  ;;  %v1446_v18 = vmul.f32 1.442695, %v1349_v9 }
 0x369   : > { %v3609_v54 = vpop.eup %2509  ;;  %1755 = vmatmul.bf16.gmra.mxu1 %v1706_v29  ;;  %1844 = vmatmul.bf16.gmra.mxu2 %v1707_v31 }
 0x36a   : > { %2511 = vpow2.f32 %v1444_v21  ;;  %v1553_v7 = vadd.f32 %v3609_v54, %v3607_v27 }
 0x36b   : > { %2513 = vpow2.f32 %v1446_v18  ;;  %v3629_v22 = vpop.f32.mrf.mxu3 }
 0x36c   : > { %1554 = vadd.xlane.f32.xlu1 %v1553_v7  ;;  %1290 = vmax.xlane.f32.xlu0 %v1289_v59  ;;  %v1295_v62 = vmax.f32 %v3629_v22, %v3623_v0 }
 0x36d   : > { %v1273_v60 = vpop.xlane.xlu0 %1272 }
 0x36e   : > { %v1350_v20 = vsub.f32 %v3497_v42, %v1273_v60  ;;  %v1351_v2 = vsub.f32 %v3495_v5, %v1273_v60  ;;  %v3641_v53 = vpop.f32.mrf.mxu0 }
 0x370   : > { %v3619_v50 = vpop.eup %2511  ;;  %v1448_v44 = vmul.f32 1.442695, %v1350_v20  ;;  %v1450_v3 = vmul.f32 1.442695, %v1351_v2 }
 0x371   : > { %v3621_v40 = vpop.eup %2513 }
 0x372   : > { %2515 = vpow2.f32 %v1448_v44  ;;  %v1556_v25 = vadd.f32 %v3621_v40, %v3619_v50 }
 0x373   : > { %2517 = vpow2.f32 %v1450_v3 }
 0x374   : > { %1557 = vadd.xlane.f32.xlu1 %v1556_v25  ;;  %1293 = vmax.xlane.f32.xlu0 %v1292_v56 }
 0x375   : > { %v1276_v5 = vpop.xlane.xlu0 %1275 }
 0x376   : > { %v1352_v42 = vsub.f32 %v3503_v30, %v1276_v5  ;;  %v1353_v34 = vsub.f32 %v3501_v39, %v1276_v5  ;;  %v3643_v30 = vpop.f32.mrf.mxu3  ;;  %v3653_v8 = vpop.f32.mrf.mxu0 }
 0x377   : > { %v1298_v32 = vmax.f32 %v3643_v30, %v3641_v53 }
 0x378   : > { %v3633_v4 = vpop.eup %2515  ;;  %v1452_v51 = vmul.f32 1.442695, %v1352_v42  ;;  %v1454_v28 = vmul.f32 1.442695, %v1353_v34 }
 0x379   : > { %v3635_v36 = vpop.eup %2517 }
 0x37a   : > { %2519 = vpow2.f32 %v1452_v51  ;;  %v1559_v45 = vadd.f32 %v3635_v36, %v3633_v4 }
 0x37b   : > { %2521 = vpow2.f32 %v1454_v28 }
 0x37c   : > { %1560 = vadd.xlane.f32.xlu2 %v1559_v45  ;;  %1296 = vmax.xlane.f32.xlu1 %v1295_v62  ;;  %2523 = vrcp.f32 %v3597_v61 }
 0x37e   : > { %v3655_v52 = vpop.f32.mrf.mxu3  ;;  %v3659_v29 = vpop.f32.mrf.mxu0 }
 0x37f   : > { %v1301_v9 = vmax.f32 %v3655_v52, %v3653_v8 }
 0x380   : > { %v3645_v39 = vpop.eup %2519 }
 0x381   : > { %v3647_v48 = vpop.eup %2521 }
 0x382   : > { %v1562_v47 = vadd.f32 %v3647_v48, %v3645_v39  ;;  %v2524_v7 = vpop.eup %2523 }
 0x383   : > { %v1652_v2 = vmul.f32 %v2524_v7, %v3487_v63  ;;  %v1653_v3 = vmul.f32 %v2524_v7, %v3489_v11 }
 0x384   : > { %1563 = vadd.xlane.f32.xlu2 %v1562_v47  ;;  %1299 = vmax.xlane.f32.xlu1 %v1298_v32 }
 0x386   : > { %v3661_v31 = vpop.f32.mrf.mxu3 }
 0x387   : > { %v1304_v21 = vmax.f32 %v3661_v31, %v3659_v29 }
 0x38c   : > { %1302 = vmax.xlane.f32.xlu2 %v1301_v9 }
 0x394   : > { %1305 = vmax.xlane.f32.xlu2 %v1304_v21 }
 0x3af   : > { %v1537_v18 = vpop.xlane.xlu1 %1536 }
 0x3b0   : > { %2525 = vrcp.f32 %v1537_v18 }
 0x3b6   : > { %v2526_v59 = vpop.eup %2525  ;;  %v1741_v60 = vpop.f32.mrf.mxu1 }
 0x3b7   : > { %v1540_v20 = vpop.xlane.xlu1 %1539  ;;  %v1654_v44 = vmul.f32 %v2526_v59, %v3519_v12  ;;  %v1655_v25 = vmul.f32 %v2526_v59, %v3521_v1 }
 0x3b8   : > { %2527 = vrcp.f32 %v1540_v20 }
 0x3b9   : > { %v1708_v56 = vpack.c.bf16 %v1654_v44, %v1652_v2  ;;  %v1709_v5 = vpack.c.bf16 %v1655_v25, %v1653_v3 }
 0x3bb   : > { %1760 = vmatmul.bf16.gmra.mxu1 %v1708_v56  ;;  %1849 = vmatmul.bf16.gmra.mxu2 %v1709_v5 }
 0x3bc   : > { %v1830_v61 = vpop.f32.mrf.mxu2 }
 0x3bd   : > { %v1831_v42 = vadd.f32 %v1830_v61, %v1741_v60 }
 0x3be   : > { %v1743_v34 = vpop.f32.mrf.mxu1  ;;  %v2528_v45 = vpop.eup %2527 }
 0x3bf   : > { %1910 = vst [vmem:[%s3673_s30] sm:$0xff] %v1831_v42  ;;  %v1543_v63 = vpop.xlane.xlu2 %1542  ;;  %v1279_v12 = vpop.xlane.xlu1 %1278  ;;  %v1656_v7 = vmul.f32 %v2528_v45, %v3529_v19 }
 0x3c0   : > { %2529 = vrcp.f32 %v1543_v63  ;;  %v1354_v11 = vsub.f32 %v3515_v6, %v1279_v12  ;;  %v1355_v1 = vsub.f32 %v3509_v26, %v1279_v12  ;;  %v1657_v6 = vmul.f32 %v2528_v45, %v3533_v46 }
 0x3c2   : > { %v1456_v51 = vmul.f32 1.442695, %v1354_v11  ;;  %v1458_v28 = vmul.f32 1.442695, %v1355_v1 }
 0x3c4   : > { %2531 = vpow2.f32 %v1456_v51  ;;  %v1832_v62 = vpop.f32.mrf.mxu2  ;;  %v3698_v51 = vpop.f32.mrf.mxu0 }
 0x3c5   : > { %2533 = vpow2.f32 %v1458_v28  ;;  %v1833_v47 = vadd.f32 %v1832_v62, %v1743_v34 }
 0x3c6   : > { %v2530_v32 = vpop.eup %2529  ;;  %v1746_v9 = vpop.f32.mrf.mxu1 }
 0x3c7   : > { %1911 = vst [vmem:[%s3673_s30 + $0x8] sm:$0xff] %v1833_v47  ;;  %v1546_v21 = vpop.xlane.xlu2 %1545  ;;  %v1282_v18 = vpop.xlane.xlu1 %1281  ;;  %v1658_v59 = vmul.f32 %v2530_v32, %v3543_v49  ;;  %v1659_v26 = vmul.f32 %v2530_v32, %v3547_v17 }
 0x3c8   : > { %v1356_v60 = vsub.f32 %v3531_v58, %v1282_v18  ;;  %v1357_v20 = vsub.f32 %v3525_v38, %v1282_v18  ;;  %v3702_v47 = vpop.f32.mrf.mxu3 }
 0x3c9   : > { %v1710_v2 = vpack.c.bf16 %v1658_v59, %v1656_v7  ;;  %v1711_v44 = vpack.c.bf16 %v1659_v26, %v1657_v6 }
 0x3ca   : > { %v3685_v3 = vpop.eup %2531  ;;  %v1460_v25 = vmul.f32 1.442695, %v1356_v60  ;;  %v1462_v56 = vmul.f32 1.442695, %v1357_v20 }
 0x3cb   : > { %v3687_v5 = vpop.eup %2533  ;;  %1765 = vmatmul.bf16.gmra.mxu1 %v1710_v2  ;;  %1854 = vmatmul.bf16.gmra.mxu2 %v1711_v44 }
 0x3cc   : > { %2535 = vpow2.f32 %v1460_v25  ;;  %v1835_v19 = vpop.f32.mrf.mxu2  ;;  %v1565_v46 = vadd.f32 %v3687_v5, %v3685_v3 }
 0x3cd   : > { %2537 = vpow2.f32 %v1462_v56  ;;  %v1836_v58 = vadd.f32 %v1835_v19, %v1746_v9 }
 0x3ce   : > { %2539 = vrcp.f32 %v1546_v21  ;;  %1566 = vadd.xlane.f32.xlu0 %v1565_v46  ;;  %v1748_v38 = vpop.f32.mrf.mxu1 }
 0x3cf   : > { %1912 = vst [vmem:[%s3673_s30 + $0x10] sm:$0xff] %v1836_v58  ;;  %v1549_v49 = vpop.xlane.xlu0 %1548  ;;  %v1285_v17 = vpop.xlane.xlu2 %1284 }
 0x3d0   : > { %2541 = vrcp.f32 %v1549_v49  ;;  %v1358_v61 = vsub.f32 %v3549_v35, %v1285_v17  ;;  %v1359_v42 = vsub.f32 %v3545_v14, %v1285_v17  ;;  %v3724_v49 = vpop.f32.mrf.mxu3 }
 0x3d2   : > { %v3694_v34 = vpop.eup %2535  ;;  %v1464_v63 = vmul.f32 1.442695, %v1358_v61  ;;  %v1466_v12 = vmul.f32 1.442695, %v1359_v42 }
 0x3d3   : > { %v3696_v11 = vpop.eup %2537 }
 0x3d4   : > { %v2540_v1 = vpop.eup %2539  ;;  %2543 = vpow2.f32 %v1464_v63  ;;  %v1837_v28 = vpop.f32.mrf.mxu2  ;;  %v1568_v45 = vadd.f32 %v3696_v11, %v3694_v34 }
 0x3d5   : > { %2545 = vpow2.f32 %v1466_v12  ;;  %v1838_v62 = vadd.f32 %v1837_v28, %v1748_v38  ;;  %v1660_v21 = vmul.f32 %v2540_v1, %v3557_v24  ;;  %v1661_v7 = vmul.f32 %v2540_v1, %v3559_v10 }
 0x3d6   : > { %v2542_v35 = vpop.eup %2541  ;;  %1569 = vadd.xlane.f32.xlu0 %v1568_v45  ;;  %v1751_v14 = vpop.f32.mrf.mxu1 }
 0x3d7   : > { %1913 = vst [vmem:[%s3673_s30 + $0x18] sm:$0xff] %v1838_v62  ;;  %v1552_v32 = vpop.xlane.xlu0 %1551  ;;  %v1288_v9 = vpop.xlane.xlu2 %1287  ;;  %v1662_v18 = vmul.f32 %v2542_v35, %v3575_v13  ;;  %v1663_v59 = vmul.f32 %v2542_v35, %v3577_v33 }
 0x3d8   : > { %v1360_v6 = vsub.f32 %v3567_v43, %v1288_v9  ;;  %v1361_v26 = vsub.f32 %v3561_v15, %v1288_v9  ;;  %v1307_v43 = vmax.f32 %v3702_v47, %v3698_v51  ;;  %v3719_v13 = vpop.f32.mrf.mxu0 }
 0x3d9   : > { %v1712_v60 = vpack.c.bf16 %v1662_v18, %v1660_v21  ;;  %v1713_v20 = vpack.c.bf16 %v1663_v59, %v1661_v7 }
 0x3da   : > { %v3711_v2 = vpop.eup %2543  ;;  %v1468_v44 = vmul.f32 1.442695, %v1360_v6  ;;  %v1470_v25 = vmul.f32 1.442695, %v1361_v26 }
 0x3db   : > { %v3713_v56 = vpop.eup %2545  ;;  %1770 = vmatmul.bf16.gmra.mxu1 %v1712_v60  ;;  %1859 = vmatmul.bf16.gmra.mxu2 %v1713_v20 }
 0x3dc   : > { %2547 = vpow2.f32 %v1468_v44  ;;  %v1840_v24 = vpop.f32.mrf.mxu2  ;;  %v1571_v10 = vadd.f32 %v3713_v56, %v3711_v2 }
 0x3dd   : > { %2549 = vpow2.f32 %v1470_v25  ;;  %v1841_v15 = vadd.f32 %v1840_v24, %v1751_v14 }
 0x3de   : > { %2551 = vrcp.f32 %v1552_v32  ;;  %1572 = vadd.xlane.f32.xlu1 %v1571_v10  ;;  %1308 = vmax.xlane.f32.xlu0 %v1307_v43  ;;  %v1753_v46 = vpop.f32.mrf.mxu1 }
 0x3df   : > { %1914 = vst [vmem:[%s3673_s30 + $0x20] sm:$0xff] %v1841_v15  ;;  %v1555_v33 = vpop.xlane.xlu1 %1554  ;;  %v1291_v19 = vpop.xlane.xlu0 %1290 }
 0x3e0   : > { %2553 = vrcp.f32 %v1555_v33  ;;  %v1362_v58 = vsub.f32 %v3587_v16, %v1291_v19  ;;  %v1363_v38 = vsub.f32 %v3583_v57, %v1291_v19  ;;  %v1310_v16 = vmax.f32 %v3724_v49, %v3719_v13  ;;  %v3741_v59 = vpop.f32.mrf.mxu0 }
 0x3e2   : > { %v3726_v17 = vpop.eup %2547  ;;  %v1472_v61 = vmul.f32 1.442695, %v1362_v58  ;;  %v1474_v42 = vmul.f32 1.442695, %v1363_v38 }
 0x3e3   : > { %v3728_v63 = vpop.eup %2549 }
 0x3e4   : > { %v2552_v12 = vpop.eup %2551  ;;  %2555 = vpow2.f32 %v1472_v61  ;;  %v1842_v1 = vpop.f32.mrf.mxu2  ;;  %v1574_v28 = vadd.f32 %v3728_v63, %v3726_v17 }
 0x3e5   : > { %2557 = vpow2.f32 %v1474_v42  ;;  %v1843_v57 = vadd.f32 %v1842_v1, %v1753_v46  ;;  %v1664_v14 = vmul.f32 %v2552_v12, %v3589_v37  ;;  %v1665_v9 = vmul.f32 %v2552_v12, %v3591_v41 }
 0x3e6   : > { %v2554_v45 = vpop.eup %2553  ;;  %1575 = vadd.xlane.f32.xlu1 %v1574_v28  ;;  %1311 = vmax.xlane.f32.xlu0 %v1310_v16  ;;  %v1756_v20 = vpop.f32.mrf.mxu1 }
 0x3e7   : > { %1915 = vst [vmem:[%s3673_s30 + $0x28] sm:$0xff] %v1843_v57  ;;  %v1558_v62 = vpop.xlane.xlu1 %1557  ;;  %v1294_v35 = vpop.xlane.xlu0 %1293  ;;  %v1666_v32 = vmul.f32 %v2554_v45, %v3607_v27  ;;  %v1667_v21 = vmul.f32 %v2554_v45, %v3609_v54 }
 0x3e8   : > { %v1364_v18 = vsub.f32 %v3611_v55, %v1294_v35  ;;  %v1365_v7 = vsub.f32 %v3605_v23, %v1294_v35  ;;  %v3747_v27 = vpop.f32.mrf.mxu3 }
 0x3e9   : > { %v1714_v6 = vpack.c.bf16 %v1666_v32, %v1664_v14  ;;  %v1715_v26 = vpack.c.bf16 %v1667_v21, %v1665_v9  ;;  %v1313_v41 = vmax.f32 %v3747_v27, %v3741_v59 }
 0x3ea   : > { %v3743_v60 = vpop.eup %2555  ;;  %v1476_v44 = vmul.f32 1.442695, %v1364_v18  ;;  %v1478_v37 = vmul.f32 1.442695, %v1365_v7 }
 0x3eb   : > { %v3745_v25 = vpop.eup %2557  ;;  %1775 = vmatmul.bf16.gmra.mxu1 %v1714_v6  ;;  %1864 = vmatmul.bf16.gmra.mxu2 %v1715_v26 }
 0x3ec   : > { %2559 = vpow2.f32 %v1476_v44  ;;  %v1845_v23 = vpop.f32.mrf.mxu2  ;;  %v1577_v54 = vadd.f32 %v3745_v25, %v3743_v60 }
 0x3ed   : > { %2561 = vpow2.f32 %v1478_v37  ;;  %v1846_v55 = vadd.f32 %v1845_v23, %v1756_v20 }
 0x3ee   : > { %2563 = vrcp.f32 %v1558_v62  ;;  %1578 = vadd.xlane.f32.xlu2 %v1577_v54  ;;  %1314 = vmax.xlane.f32.xlu1 %v1313_v41  ;;  %v1758_v61 = vpop.f32.mrf.mxu1 }
 0x3ef   : > { %1916 = vst [vmem:[%s3673_s30 + $0x30] sm:$0xff] %v1846_v55  ;;  %v1561_v24 = vpop.xlane.xlu2 %1560  ;;  %v1297_v10 = vpop.xlane.xlu1 %1296 }
 0x3f0   : > { %2565 = vrcp.f32 %v1561_v24  ;;  %v1366_v43 = vsub.f32 %v3629_v22, %v1297_v10  ;;  %v1367_v15 = vsub.f32 %v3623_v0, %v1297_v10 }
 0x3f2   : > { %v3756_v33 = vpop.eup %2559  ;;  %v1480_v19 = vmul.f32 1.442695, %v1366_v43  ;;  %v1482_v46 = vmul.f32 1.442695, %v1367_v15 }
 0x3f3   : > { %v3758_v58 = vpop.eup %2561 }
 0x3f4   : > { %v2564_v38 = vpop.eup %2563  ;;  %2567 = vpow2.f32 %v1480_v19  ;;  %v1847_v42 = vpop.f32.mrf.mxu2  ;;  %v1580_v12 = vadd.f32 %v3758_v58, %v3756_v33 }
 0x3f5   : > { %2569 = vpow2.f32 %v1482_v46  ;;  %v1848_v1 = vadd.f32 %v1847_v42, %v1758_v61  ;;  %v1668_v16 = vmul.f32 %v2564_v38, %v3619_v50  ;;  %v1669_v45 = vmul.f32 %v2564_v38, %v3621_v40 }
 0x3f6   : > { %v2566_v28 = vpop.eup %2565  ;;  %1581 = vadd.xlane.f32.xlu2 %v1580_v12 }
 0x3f7   : > { %1917 = vst [vmem:[%s3673_s30 + $0x38] sm:$0xff] %v1848_v1  ;;  %v1564_v22 = vpop.xlane.xlu2 %1563  ;;  %v1300_v0 = vpop.xlane.xlu1 %1299  ;;  %v1670_v57 = vmul.f32 %v2566_v28, %v3633_v4  ;;  %v1671_v62 = vmul.f32 %v2566_v28, %v3635_v36 }
 0x3f8   : > { %v1368_v35 = vsub.f32 %v3643_v30, %v1300_v0  ;;  %v1369_v14 = vsub.f32 %v3641_v53, %v1300_v0 }
 0x3f9   : > { %v1716_v32 = vpack.c.bf16 %v1670_v57, %v1668_v16  ;;  %v1717_v9 = vpack.c.bf16 %v1671_v62, %v1669_v45 }
 0x3fa   : > { %v3769_v21 = vpop.eup %2567  ;;  %v1484_v18 = vmul.f32 1.442695, %v1368_v35  ;;  %v1486_v7 = vmul.f32 1.442695, %v1369_v14 }
 0x3fb   : > { %v3771_v6 = vpop.eup %2569  ;;  %1780 = vmatmul.bf16.gmra.mxu1 %v1716_v32  ;;  %1869 = vmatmul.bf16.gmra.mxu2 %v1717_v9 }
 0x3fc   : > { %2571 = vpow2.f32 %v1484_v18  ;;  %v1583_v50 = vadd.f32 %v3771_v6, %v3769_v21 }
 0x3fd   : > { %2573 = vpow2.f32 %v1486_v7 }
 0x3fe   : > { %1584 = vadd.xlane.f32.xlu0 %v1583_v50 }
 0x3ff   : > { %v1303_v40 = vpop.xlane.xlu2 %1302 }
 0x400   : > { %v1370_v4 = vsub.f32 %v3655_v52, %v1303_v40  ;;  %v1371_v36 = vsub.f32 %v3653_v8, %v1303_v40 }
 0x402   : > { %v3777_v53 = vpop.eup %2571  ;;  %v1488_v30 = vmul.f32 1.442695, %v1370_v4  ;;  %v1490_v26 = vmul.f32 1.442695, %v1371_v36 }
 0x403   : > { %v3779_v20 = vpop.eup %2573 }
 0x404   : > { %2575 = vpow2.f32 %v1488_v30  ;;  %v1586_v44 = vadd.f32 %v3779_v20, %v3777_v53 }
 0x405   : > { %2577 = vpow2.f32 %v1490_v26 }
 0x406   : > { %1587 = vadd.xlane.f32.xlu1 %v1586_v44 }
 0x407   : > { %v1306_v37 = vpop.xlane.xlu2 %1305 }
 0x408   : > { %v1372_v41 = vsub.f32 %v3661_v31, %v1306_v37  ;;  %v1373_v23 = vsub.f32 %v3659_v29, %v1306_v37 }
 0x40a   : > { %v3785_v52 = vpop.eup %2575  ;;  %v1492_v8 = vmul.f32 1.442695, %v1372_v41  ;;  %v1494_v54 = vmul.f32 1.442695, %v1373_v23 }
 0x40b   : > { %v3787_v55 = vpop.eup %2577 }
 0x40c   : > { %2579 = vpow2.f32 %v1492_v8  ;;  %v1589_v24 = vadd.f32 %v3787_v55, %v3785_v52 }
 0x40d   : > { %2581 = vpow2.f32 %v1494_v54 }
 0x40e   : > { %1590 = vadd.xlane.f32.xlu2 %v1589_v24  ;;  %2583 = vrcp.f32 %v1564_v22 }
 0x412   : > { %v3791_v10 = vpop.eup %2579 }
 0x413   : > { %v3793_v43 = vpop.eup %2581 }
 0x414   : > { %v1592_v29 = vadd.f32 %v3793_v43, %v3791_v10  ;;  %v2584_v61 = vpop.eup %2583 }
 0x415   : > { %v1672_v16 = vmul.f32 %v2584_v61, %v3645_v39  ;;  %v1673_v45 = vmul.f32 %v2584_v61, %v3647_v48 }
 0x416   : > { %1593 = vadd.xlane.f32.xlu0 %v1592_v29 }
 0x438   : > { %v1761_v31 = vpop.f32.mrf.mxu1 }
 0x43e   : > { %v1850_v15 = vpop.f32.mrf.mxu2 }
 0x43f   : > { %v1851_v19 = vadd.f32 %v1850_v15, %v1761_v31 }
 0x440   : > { %v1763_v46 = vpop.f32.mrf.mxu1 }
 0x441   : > { %1918 = vst [vmem:[%s3673_s30 + $0x40] sm:$0xff] %v1851_v19  ;;  %v1567_v38 = vpop.xlane.xlu0 %1566 }
 0x442   : > { %2585 = vrcp.f32 %v1567_v38 }
 0x446   : > { %v1852_v42 = vpop.f32.mrf.mxu2 }
 0x447   : > { %v1853_v12 = vadd.f32 %v1852_v42, %v1763_v46 }
 0x448   : > { %v2586_v1 = vpop.eup %2585  ;;  %v1766_v28 = vpop.f32.mrf.mxu1 }
 0x449   : > { %1919 = vst [vmem:[%s3673_s30 + $0x48] sm:$0xff] %v1853_v12  ;;  %v1570_v0 = vpop.xlane.xlu0 %1569  ;;  %v1674_v57 = vmul.f32 %v2586_v1, %v3685_v3  ;;  %v1675_v22 = vmul.f32 %v2586_v1, %v3687_v5 }
 0x44a   : > { %2587 = vrcp.f32 %v1570_v0 }
 0x44b   : > { %v1718_v62 = vpack.c.bf16 %v1674_v57, %v1672_v16  ;;  %v1719_v35 = vpack.c.bf16 %v1675_v22, %v1673_v45 }
 0x44d   : > { %1785 = vmatmul.bf16.gmra.mxu1 %v1718_v62  ;;  %1874 = vmatmul.bf16.gmra.mxu2 %v1719_v35 }
 0x44e   : > { %v1855_v14 = vpop.f32.mrf.mxu2 }
 0x44f   : > { %v1856_v32 = vadd.f32 %v1855_v14, %v1766_v28 }
 0x450   : > { %v1768_v9 = vpop.f32.mrf.mxu1  ;;  %v2588_v5 = vpop.eup %2587 }
 0x451   : > { %1920 = vst [vmem:[%s3673_s30 + $0x50] sm:$0xff] %v1856_v32  ;;  %v1573_v18 = vpop.xlane.xlu1 %1572  ;;  %v1309_v7 = vpop.xlane.xlu0 %1308  ;;  %v1676_v37 = vmul.f32 %v2588_v5, %v3694_v34 }
 0x452   : > { %2589 = vrcp.f32 %v1573_v18  ;;  %v1374_v39 = vsub.f32 %v3702_v47, %v1309_v7  ;;  %v1375_v3 = vsub.f32 %v3698_v51, %v1309_v7  ;;  %v1677_v47 = vmul.f32 %v2588_v5, %v3696_v11 }
 0x454   : > { %v1496_v48 = vmul.f32 1.442695, %v1374_v39  ;;  %v1498_v50 = vmul.f32 1.442695, %v1375_v3 }
 0x456   : > { %2591 = vpow2.f32 %v1496_v48  ;;  %v1857_v40 = vpop.f32.mrf.mxu2 }
 0x457   : > { %2593 = vpow2.f32 %v1498_v50  ;;  %v1858_v4 = vadd.f32 %v1857_v40, %v1768_v9 }
 0x458   : > { %v2590_v36 = vpop.eup %2589  ;;  %v1771_v30 = vpop.f32.mrf.mxu1 }
 0x459   : > { %1921 = vst [vmem:[%s3673_s30 + $0x58] sm:$0xff] %v1858_v4  ;;  %v1576_v26 = vpop.xlane.xlu1 %1575  ;;  %v1312_v44 = vpop.xlane.xlu0 %1311  ;;  %v1678_v41 = vmul.f32 %v2590_v36, %v3711_v2  ;;  %v1679_v51 = vmul.f32 %v2590_v36, %v3713_v56 }
 0x45a   : > { %v1376_v23 = vsub.f32 %v3724_v49, %v1312_v44  ;;  %v1377_v8 = vsub.f32 %v3719_v13, %v1312_v44 }
 0x45b   : > { %v1720_v54 = vpack.c.bf16 %v1678_v41, %v1676_v37  ;;  %v1721_v24 = vpack.c.bf16 %v1679_v51, %v1677_v47 }
 0x45c   : > { %v3813_v29 = vpop.eup %2591  ;;  %v1500_v31 = vmul.f32 1.442695, %v1376_v23  ;;  %v1502_v15 = vmul.f32 1.442695, %v1377_v8 }
 0x45d   : > { %v3815_v19 = vpop.eup %2593  ;;  %1790 = vmatmul.bf16.gmra.mxu1 %v1720_v54  ;;  %1879 = vmatmul.bf16.gmra.mxu2 %v1721_v24 }
 0x45e   : > { %2595 = vpow2.f32 %v1500_v31  ;;  %v1860_v34 = vpop.f32.mrf.mxu2  ;;  %v1595_v11 = vadd.f32 %v3815_v19, %v3813_v29 }
 0x45f   : > { %2597 = vpow2.f32 %v1502_v15  ;;  %v1861_v2 = vadd.f32 %v1860_v34, %v1771_v30 }
 0x460   : > { %2599 = vrcp.f32 %v1576_v26  ;;  %1596 = vadd.xlane.f32.xlu1 %v1595_v11  ;;  %v1773_v56 = vpop.f32.mrf.mxu1 }
 0x461   : > { %1922 = vst [vmem:[%s3673_s30 + $0x60] sm:$0xff] %v1861_v2  ;;  %v1579_v13 = vpop.xlane.xlu2 %1578  ;;  %v1315_v49 = vpop.xlane.xlu1 %1314 }
 0x462   : > { %2601 = vrcp.f32 %v1579_v13  ;;  %v1378_v46 = vsub.f32 %v3747_v27, %v1315_v49  ;;  %v1379_v38 = vsub.f32 %v3741_v59, %v1315_v49 }
 0x464   : > { %v3822_v61 = vpop.eup %2595  ;;  %v1504_v42 = vmul.f32 1.442695, %v1378_v46  ;;  %v1506_v12 = vmul.f32 1.442695, %v1379_v38 }
 0x465   : > { %v3824_v1 = vpop.eup %2597 }
 0x466   : > { %v2600_v28 = vpop.eup %2599  ;;  %2603 = vpow2.f32 %v1504_v42  ;;  %v1862_v0 = vpop.f32.mrf.mxu2  ;;  %v1598_v16 = vadd.f32 %v3824_v1, %v3822_v61 }
 0x467   : > { %2605 = vpow2.f32 %v1506_v12  ;;  %v1863_v57 = vadd.f32 %v1862_v0, %v1773_v56  ;;  %v1680_v59 = vmul.f32 %v2600_v28, %v3726_v17  ;;  %v1681_v62 = vmul.f32 %v2600_v28, %v3728_v63 }
 0x468   : > { %v2602_v45 = vpop.eup %2601  ;;  %1599 = vadd.xlane.f32.xlu2 %v1598_v16  ;;  %v1776_v22 = vpop.f32.mrf.mxu1 }
 0x469   : > { %1923 = vst [vmem:[%s3673_s30 + $0x68] sm:$0xff] %v1863_v57  ;;  %v1682_v27 = vmul.f32 %v2602_v45, %v3743_v60  ;;  %v1683_v35 = vmul.f32 %v2602_v45, %v3745_v25  ;;  %v1582_v7 = vpop.xlane.xlu2 %1581 }
 0x46a   : > { %2607 = vrcp.f32 %v1582_v7 }
 0x46b   : > { %v1722_v14 = vpack.c.bf16 %v1682_v27, %v1680_v59  ;;  %v1723_v32 = vpack.c.bf16 %v1683_v35, %v1681_v62 }
 0x46c   : > { %v3833_v9 = vpop.eup %2603 }
 0x46d   : > { %v3835_v18 = vpop.eup %2605  ;;  %1795 = vmatmul.bf16.gmra.mxu1 %v1722_v14  ;;  %1884 = vmatmul.bf16.gmra.mxu2 %v1723_v32 }
 0x46e   : > { %v1865_v39 = vpop.f32.mrf.mxu2  ;;  %v1601_v17 = vadd.f32 %v3835_v18, %v3833_v9 }
 0x46f   : > { %v1866_v3 = vadd.f32 %v1865_v39, %v1776_v22 }
 0x470   : > { %1602 = vadd.xlane.f32.xlu0 %v1601_v17  ;;  %v1778_v60 = vpop.f32.mrf.mxu1  ;;  %v2608_v25 = vpop.eup %2607 }
 0x471   : > { %1924 = vst [vmem:[%s3673_s30 + $0x70] sm:$0xff] %v1866_v3  ;;  %v1585_v63 = vpop.xlane.xlu0 %1584  ;;  %v1684_v40 = vmul.f32 %v2608_v25, %v3756_v33  ;;  %v1685_v36 = vmul.f32 %v2608_v25, %v3758_v58 }
 0x472   : > { %2609 = vrcp.f32 %v1585_v63 }
 0x476   : > { %v1867_v48 = vpop.f32.mrf.mxu2 }
 0x477   : > { %v1868_v50 = vadd.f32 %v1867_v48, %v1778_v60 }
 0x478   : > { %v2610_v5 = vpop.eup %2609  ;;  %v1781_v37 = vpop.f32.mrf.mxu1 }
 0x479   : > { %1925 = vst [vmem:[%s3673_s30 + $0x78] sm:$0xff] %v1868_v50  ;;  %v1686_v4 = vmul.f32 %v2610_v5, %v3769_v21  ;;  %v1687_v30 = vmul.f32 %v2610_v5, %v3771_v6  ;;  %v1588_v41 = vpop.xlane.xlu1 %1587 }
 0x47a   : > { %2611 = vrcp.f32 %v1588_v41 }
 0x47b   : > { %v1724_v26 = vpack.c.bf16 %v1686_v4, %v1684_v40  ;;  %v1725_v44 = vpack.c.bf16 %v1687_v30, %v1685_v36 }
 0x47d   : > { %1800 = vmatmul.bf16.gmra.mxu1 %v1724_v26  ;;  %1889 = vmatmul.bf16.gmra.mxu2 %v1725_v44 }
 0x47e   : > { %v1870_v47 = vpop.f32.mrf.mxu2 }
 0x47f   : > { %v1871_v51 = vadd.f32 %v1870_v47, %v1781_v37 }
 0x480   : > { %v2612_v33 = vpop.eup %2611  ;;  %v1783_v8 = vpop.f32.mrf.mxu1 }
 0x481   : > { %1926 = vst [vmem:[%s3673_s30 + $0x80] sm:$0xff] %v1871_v51  ;;  %v1591_v23 = vpop.xlane.xlu2 %1590  ;;  %v1688_v6 = vmul.f32 %v2612_v33, %v3777_v53  ;;  %v1689_v31 = vmul.f32 %v2612_v33, %v3779_v20 }
 0x482   : > { %2613 = vrcp.f32 %v1591_v23 }
 0x486   : > { %v1872_v21 = vpop.f32.mrf.mxu2 }
 0x487   : > { %v1873_v54 = vadd.f32 %v1872_v21, %v1783_v8 }
 0x488   : > { %v2614_v58 = vpop.eup %2613 }
 0x489   : > { %1927 = vst [vmem:[%s3673_s30 + $0x88] sm:$0xff] %v1873_v54  ;;  %v1690_v24 = vmul.f32 %v2614_v58, %v3785_v52  ;;  %v1691_v15 = vmul.f32 %v2614_v58, %v3787_v55  ;;  %v1594_v56 = vpop.xlane.xlu0 %1593 }
 0x48a   : > { %2615 = vrcp.f32 %v1594_v56 }
 0x48b   : > { %v1726_v34 = vpack.c.bf16 %v1690_v24, %v1688_v6  ;;  %v1727_v11 = vpack.c.bf16 %v1691_v15, %v1689_v31 }
 0x48d   : > { %1805 = vmatmul.bf16.gmra.mxu1 %v1726_v34  ;;  %1894 = vmatmul.bf16.gmra.mxu2 %v1727_v11 }
 0x490   : > { %v2616_v53 = vpop.eup %2615 }
 0x491   : > { %v1692_v12 = vmul.f32 %v2616_v53, %v3791_v10  ;;  %v1693_v0 = vmul.f32 %v2616_v53, %v3793_v43 }
 0x4ca   : > { %v1786_v2 = vpop.f32.mrf.mxu1 }
 0x4d0   : > { %v1875_v13 = vpop.f32.mrf.mxu2 }
 0x4d1   : > { %v1876_v49 = vadd.f32 %v1875_v13, %v1786_v2 }
 0x4d2   : > { %v1788_v46 = vpop.f32.mrf.mxu1 }
 0x4d3   : > { %1928 = vst [vmem:[%s3673_s30 + $0x90] sm:$0xff] %v1876_v49  ;;  %v1597_v38 = vpop.xlane.xlu1 %1596 }
 0x4d4   : > { %2617 = vrcp.f32 %v1597_v38 }
 0x4d8   : > { %v1877_v52 = vpop.f32.mrf.mxu2 }
 0x4d9   : > { %v1878_v42 = vadd.f32 %v1877_v52, %v1788_v46 }
 0x4da   : > { %v2618_v20 = vpop.eup %2617  ;;  %v1791_v55 = vpop.f32.mrf.mxu1 }
 0x4db   : > { %1929 = vst [vmem:[%s3673_s30 + $0x98] sm:$0xff] %v1878_v42  ;;  %v1694_v28 = vmul.f32 %v2618_v20, %v3813_v29  ;;  %v1695_v16 = vmul.f32 %v2618_v20, %v3815_v19  ;;  %v1600_v22 = vpop.xlane.xlu2 %1599 }
 0x4dc   : > { %2619 = vrcp.f32 %v1600_v22 }
 0x4dd   : > { %v1728_v57 = vpack.c.bf16 %v1694_v28, %v1692_v12  ;;  %v1729_v45 = vpack.c.bf16 %v1695_v16, %v1693_v0 }
 0x4df   : > { %1810 = vmatmul.bf16.gmra.mxu1 %v1728_v57  ;;  %1899 = vmatmul.bf16.gmra.mxu2 %v1729_v45 }
 0x4e0   : > { %v1880_v59 = vpop.f32.mrf.mxu2 }
 0x4e1   : > { %v1881_v27 = vadd.f32 %v1880_v59, %v1791_v55 }
 0x4e2   : > { %v1793_v62 = vpop.f32.mrf.mxu1  ;;  %v2620_v10 = vpop.eup %2619 }
 0x4e3   : > { %1930 = vst [vmem:[%s3673_s30 + $0xa0] sm:$0xff] %v1881_v27  ;;  %v1603_v35 = vpop.xlane.xlu0 %1602  ;;  %v1696_v19 = vmul.f32 %v2620_v10, %v3822_v61  ;;  %v1697_v39 = vmul.f32 %v2620_v10, %v3824_v1 }
 0x4e4   : > { %2621 = vrcp.f32 %v1603_v35 }
 0x4e8   : > { %v1882_v14 = vpop.f32.mrf.mxu2 }
 0x4e9   : > { %v1883_v29 = vadd.f32 %v1882_v14, %v1793_v62 }
 0x4ea   : > { %v2622_v43 = vpop.eup %2621  ;;  %v1796_v32 = vpop.f32.mrf.mxu1 }
 0x4eb   : > { %1931 = vst [vmem:[%s3673_s30 + $0xa8] sm:$0xff] %v1883_v29  ;;  %v1698_v7 = vmul.f32 %v2622_v43, %v3833_v9  ;;  %v1699_v17 = vmul.f32 %v2622_v43, %v3835_v18 }
 0x4ed   : > { %v1730_v3 = vpack.c.bf16 %v1698_v7, %v1696_v19  ;;  %v1731_v63 = vpack.c.bf16 %v1699_v17, %v1697_v39 }
 0x4ef   : > { %1815 = vmatmul.bf16.gmra.mxu1 %v1730_v3  ;;  %1904 = vmatmul.bf16.gmra.mxu2 %v1731_v63 }
 0x4f0   : > { %v1885_v60 = vpop.f32.mrf.mxu2 }
 0x4f1   : > { %v1886_v25 = vadd.f32 %v1885_v60, %v1796_v32 }
 0x4f2   : > { %v1798_v48 = vpop.f32.mrf.mxu1 }
 0x4f3   : > { %1932 = vst [vmem:[%s3673_s30 + $0xb0] sm:$0xff] %v1886_v25 }
 0x4f8   : > { %v1887_v50 = vpop.f32.mrf.mxu2 }
 0x4f9   : > { %v1888_v5 = vadd.f32 %v1887_v50, %v1798_v48 }
 0x4fa   : > { %v1801_v61 = vpop.f32.mrf.mxu1 }
 0x4fb   : > { %1933 = vst [vmem:[%s3673_s30 + $0xb8] sm:$0xff] %v1888_v5 }
 0x500   : > { %v1890_v9 = vpop.f32.mrf.mxu2 }
 0x501   : > { %v1891_v1 = vadd.f32 %v1890_v9, %v1801_v61 }
 0x502   : > { %v1803_v18 = vpop.f32.mrf.mxu1 }
 0x503   : > { %1934 = vst [vmem:[%s3673_s30 + $0xc0] sm:$0xff] %v1891_v1 }
 0x508   : > { %v1892_v40 = vpop.f32.mrf.mxu2 }
 0x509   : > { %v1893_v4 = vadd.f32 %v1892_v40, %v1803_v18 }
 0x50a   : > { %v1806_v36 = vpop.f32.mrf.mxu1 }
 0x50b   : > { %1935 = vst [vmem:[%s3673_s30 + $0xc8] sm:$0xff] %v1893_v4 }
 0x510   : > { %v1895_v30 = vpop.f32.mrf.mxu2 }
 0x511   : > { %v1896_v26 = vadd.f32 %v1895_v30, %v1806_v36 }
 0x512   : > { %v1808_v44 = vpop.f32.mrf.mxu1 }
 0x513   : > { %1936 = vst [vmem:[%s3673_s30 + $0xd0] sm:$0xff] %v1896_v26 }
 0x518   : > { %v1897_v37 = vpop.f32.mrf.mxu2 }
 0x519   : > { %v1898_v41 = vadd.f32 %v1897_v37, %v1808_v44 }
 0x51b   : > { %1937 = vst [vmem:[%s3673_s30 + $0xd8] sm:$0xff] %v1898_v41 }
 0x55c   : > { %v1811_v47 = vpop.f32.mrf.mxu1 }
 0x562   : > { %v1900_v51 = vpop.f32.mrf.mxu2 }
 0x563   : > { %v1901_v23 = vadd.f32 %v1900_v51, %v1811_v47 }
 0x564   : > { %v1813_v33 = vpop.f32.mrf.mxu1 }
 0x565   : > { %1938 = vst [vmem:[%s3673_s30 + $0xe0] sm:$0xff] %v1901_v23 }
 0x56a   : > { %v1902_v8 = vpop.f32.mrf.mxu2 }
 0x56b   : > { %v1903_v21 = vadd.f32 %v1902_v8, %v1813_v33 }
 0x56c   : > { %v1816_v54 = vpop.f32.mrf.mxu1 }
 0x56d   : > { %1939 = vst [vmem:[%s3673_s30 + $0xe8] sm:$0xff] %v1903_v21 }
 0x572   : > { %v1905_v58 = vpop.f32.mrf.mxu2 }
 0x573   : > { %v1906_v6 = vadd.f32 %v1905_v58, %v1816_v54 }
 0x574   : > { %v1818_v24 = vpop.f32.mrf.mxu1 }
 0x575   : > { %1940 = vst [vmem:[%s3673_s30 + $0xf0] sm:$0xff] %v1906_v6 }
 0x57a   : > { %v1907_v31 = vpop.f32.mrf.mxu2 }
 0x57b   : > { %v1908_v15 = vadd.f32 %v1907_v31, %v1818_v24 }
 0x57d   : > { %1941 = vst [vmem:[%s3673_s30 + $0xf8] sm:$0xff] %v1908_v15 }
 0x57e   : > { %2650 = shalt.err (!%p2647_p5)
}
 0x57f   : > { %s2703_s8 = smov 128   ;;  %s2704_s30 = smov 8  }
 0x580   : > { %2373 = dma.vmem_to_hbm [thread:$0]  (%p2780_p4), %s1958_s15, 4096, %s1960_s16, %s1943_s17, %s2703_s8, %s2703_s8, %s2704_s30  }
 0x581 PF: > { %p2379_p6 = scmp.ge.s32.totalorder %s2701_s26, 2  ;;  %s1974_s12 = sand.u32 1, %s2681_s21  }
 0x582   : > { %s1975_s13 = scalar_lea.sflag [#allocation3], %s1974_s12 }
 0x583   : > { %p2376_p7 = pnand %p2379_p6, %p2787_p8 }
 0x585   : > { %p2377_p9 = pneg %p2376_p7 }
 0x587   : > { %2676 = dma.done.wait (%p2377_p9), %s1975_s13, 4096  }
 0x588   : > { %2678 = vsyncadd (%p2377_p9), %s1975_s13, 4294963200  ;;  %s19_s26 = sadd.s32 1, %s2701_s26   ;;  %s3921_s21 = smov %s2685_s22 }
 0x589   : > { %p16_p10 = scmp.ge.s32.totalorder %s19_s26, 4   ;;  %s3922_s22 = smov %s2689_s23 }
 0x58a   : > { %s3923_s23 = smov %s2793_s10  ;;  %s3924_s24 = smov %s2697_s25 }
 0x58b   : > { %s3925_s25 = smov %s3927_s29  ;;  %18 = sbr.rel (!%p16_p10) target bundleno = 4 (0x4), region = 82 }
 0x590   :  { %1981 = vsyncpa [#allocation3], 1 }
 0x591   :  { %1983 = vsyncpa [#allocation3 + $0x1], 1 }

</bundles_post_ra>
